<compile_context>
chip_gen: v6e
topology: v6e:2x2x1
jax: 0.10.0
libtpu: 0.0.40
codegen_flags: <defaults>
</compile_context>

<pallas_src>
import functools

import numpy as np
import jax
import jax.numpy as jnp
from jax import lax
from jax.experimental import pallas as pl
from jax.experimental.pallas import tpu as pltpu

# ----------------------------- model config ---------------------------------
# InceptionTime(c_in, c_out, nf, ks=9): ks -> [9, 4, 2] -> odd-adjust -> [9, 3, 1]
C_IN, C_OUT = 4, 3
NF = 8
C4 = 4 * NF                      # 32 channels after concat
KS = 9
DEPTH = 6
BATCH, LEN = 2, 16
KS_LIST = tuple(k if k % 2 != 0 else k - 1 for k in (KS // 2 ** i for i in range(3)))
N_TAP = KS_LIST[0]               # 9 shifts cover every branch's taps
PAD = (N_TAP - 1) // 2           # 4 -> "same" padding for the widest conv
LP = LEN + 2 * PAD               # per-sample stride in the slab (24)
W_DATA = BATCH * LP              # 48 real columns
W = max(128, ((W_DATA + 127) // 128) * 128)   # lane width padded to full vregs
K_IM = N_TAP * NF                # 72 im2col rows (9 shifted bottleneck copies)
K_TOT = K_IM + C4                # 104 (+ 32 max-pooled input rows)
K_FULL = K_TOT + C4              # 136 (+ 32 residual rows for the fused shortcut)
RW = 2 * C4 + NF                 # 72 weight rows per module in the packed slab
BN_EPS = 1e-5


# ------------------------------ fused Pallas kernel ---------------------------
def _inception_time_kernel(x0_ref, wmod_ref, epi_ref, out_ref):
    """Whole InceptionTime forward on a (C4, W) VMEM-resident padded slab."""
    # Per-lane masks, generated in-kernel (no DMA) and broadcast once to (C4, W).
    lane = lax.broadcasted_iota(jnp.int32, (C4, W), 1)
    valid_b = first_b = last_b = None
    for n in range(BATCH):                         # tiny static loop (BATCH terms)
        s = n * LP + PAD
        v = (lane >= s) & (lane < s + LEN)
        f = lane == s
        e = lane == s + LEN - 1
        valid_b = v if valid_b is None else valid_b | v
        first_b = f if first_b is None else first_b | f
        last_b = e if last_b is None else last_b | e

    epi = epi_ref[...]                             # (C4, 9): BN shifts + fc bias
    x = x0_ref[...]                                # (C4, W) padded activation slab
    res = x                                        # residual source for d=2
    head_w = None

    for d in range(DEPTH):
        wd = wmod_ref[d]                           # (RW, K_FULL) packed weights
        if d == 0:
            # final FC weight is stashed in module 0's otherwise-unused block.
            head_w = wd[C4:C4 + C_OUT, K_TOT:K_TOT + C4]          # (C_OUT, C4)

        # bottleneck 1x1 (bias-free): zero pad columns stay exactly zero.
        b = jnp.dot(wd[2 * C4:, :C4], x, preferred_element_type=jnp.float32)

        # im2col: 9 lane-rotated copies of the bottleneck output.  Wrap-around
        # lands only in pad columns (and pulls zeros), masked by `valid_b`.
        blocks = [b if t == PAD else pltpu.roll(b, (PAD - t) % W, axis=1)
                  for t in range(N_TAP)]

        # MaxPool1d(3, stride=1, padding=1) on the module input: sequence edges
        # use the centre value (== -inf padding semantics).
        xl = jnp.where(first_b, x, pltpu.roll(x, 1, axis=1))
        xr = jnp.where(last_b, x, pltpu.roll(x, W - 1, axis=1))
        mp = jnp.maximum(jnp.maximum(xl, x), xr)

        cols = jnp.concatenate(blocks + [mp], axis=0)             # (K_TOT, W)
        sh = epi[:, d:d + 1]                                      # folded BN shift

        if d % 3 == 2:
            # residual module: shortcut 1x1 conv fused into the same matmul.
            r = d // 3
            op = jnp.concatenate([cols, res], axis=0)             # (K_FULL, W)
            y2 = jnp.dot(wd[:2 * C4, :], op,
                         preferred_element_type=jnp.float32)      # (2*C4, W)
            y = jnp.maximum(y2[:C4] + sh, 0.0)                    # module BN+ReLU
            y = jnp.maximum(y + y2[C4:] + epi[:, 6 + r:7 + r], 0.0)
            y = jnp.where(valid_b, y, 0.0)                        # re-zero padding
            res = y
        else:
            y2 = jnp.dot(wd[:C4, :K_TOT], cols,
                         preferred_element_type=jnp.float32)      # (C4, W)
            y = jnp.where(valid_b, jnp.maximum(y2 + sh, 0.0), 0.0)
        x = y

    # head: GAP over time (matmul against an iota-built selector) + Linear + Sigmoid.
    colb = lax.broadcasted_iota(jnp.int32, (W, BATCH), 0)
    smpb = lax.broadcasted_iota(jnp.int32, (W, BATCH), 1)
    start = smpb * LP + PAD
    gsel = jnp.where((colb >= start) & (colb < start + LEN), 1.0 / LEN, 0.0)
    gap_t = jnp.dot(x, gsel, preferred_element_type=jnp.float32)          # (C4, N)
    logits_t = jnp.dot(head_w, gap_t, preferred_element_type=jnp.float32) # (C_OUT, N)
    out_ref[...] = jax.nn.sigmoid(logits_t + epi[:C_OUT, 8:9])


# ------------------------------ host-side packing ------------------------------
def _pack_params(params):
    """Pack all weights into TWO f32 slabs (packed once, reused every call).

    wmod[d] layout (RW=72 rows x K_FULL=136 cols):
      [ 0:32,   0:104]  four branch convs stacked per tap, BN scale folded in
      [32:64, 104:136]  residual-shortcut 1x1 conv (d=2,5 only), BN scale folded
      [64:72,   0: 32]  bottleneck 1x1 conv
      [32:35, 104:136]  (d=0 only, otherwise-unused block) final FC weight
    epi columns: 0..5 per-module BN shift, 6..7 shortcut BN shift, 8 fc bias.
    """
    wmod = np.zeros((DEPTH, RW, K_FULL), np.float32)
    epi = np.zeros((C4, 9), np.float32)
    for d in range(DEPTH):
        p = params['mod'][d]
        scale = np.asarray(p['scale'], np.float32).reshape(C4, 1)
        shift = np.asarray(p['shift'], np.float32).reshape(C4, 1)
        ni = np.asarray(p['wb']).shape[1]
        wmod[d, 2 * C4:2 * C4 + NF, :ni] = np.asarray(p['wb'])
        for bi, (wconv, k) in enumerate(zip(p['wc'], KS_LIST)):
            wnp = np.asarray(wconv)                               # (NF, NF, k)
            pk = (k - 1) // 2
            for t in range(k):
                blk = t - pk + PAD                 # position among the 9 shifts
                wmod[d, bi * NF:(bi + 1) * NF, blk * NF:(blk + 1) * NF] = wnp[:, :, t]
        wmod[d, 3 * NF:4 * NF, K_IM:K_IM + ni] = np.asarray(p['wmcp'])
        wmod[d, :C4, :K_TOT] *= scale              # fold BN scale into the convs
        epi[:, d:d + 1] = shift
        if d % 3 == 2:
            r = d // 3
            sp = params['shortcut'][r]
            wsc = np.asarray(sp['w'], np.float32)                 # (C4, n_in)
            rscale = np.asarray(sp['scale'], np.float32).reshape(C4, 1)
            wmod[d, C4:2 * C4, K_TOT:K_TOT + wsc.shape[1]] = wsc * rscale
            epi[:, 6 + r:7 + r] = np.asarray(sp['shift'], np.float32).reshape(C4, 1)
    # head weights stashed in module 0's unused shortcut block / epi column 8.
    wmod[0, C4:C4 + C_OUT, K_TOT:K_TOT + C4] = np.asarray(params['head']['wfc'])
    epi[:C_OUT, 8:9] = np.asarray(params['head']['bfc'], np.float32).reshape(C_OUT, 1)
    return jnp.asarray(wmod), jnp.asarray(epi)


def _pack_input(x):
    """(N, C_IN, L) -> channel-padded, time-padded, lane-padded (C4, W) slab."""
    xt = jnp.transpose(x, (1, 0, 2)).astype(jnp.float32)          # (C_IN, N, L)
    xt = jnp.pad(xt, ((0, C4 - C_IN), (0, 0), (PAD, PAD)))        # (C4, N, LP)
    slab = xt.reshape(C4, W_DATA)
    return jnp.pad(slab, ((0, 0), (0, W - W_DATA)))


_VMEM = functools.partial(pl.BlockSpec, memory_space=pltpu.MemorySpace.VMEM)

_fused_call = pl.pallas_call(
    _inception_time_kernel,
    out_shape=jax.ShapeDtypeStruct((C_OUT, BATCH), jnp.float32),
    in_specs=[_VMEM(), _VMEM(), _VMEM()],
    out_specs=_VMEM(),
)


@jax.jit
def _forward_jit(x, wmod, epi):
    # input packing + fused kernel + tiny transpose run as one compiled program.
    return _fused_call(_pack_input(x), wmod, epi).T               # (N, C_OUT)


def make_forward(params):
    wmod, epi = _pack_params(params)           # host-side packing, done ONCE
    return lambda x: _forward_jit(x, wmod, epi)


# ------------------------------ parameters ------------------------------------
def _bn_fold(key, c):
    k1, k2 = jax.random.split(key)
    gamma = 1.0 + 0.1 * jax.random.normal(k1, (c,), jnp.float32)
    beta = 0.1 * jax.random.normal(k2, (c,), jnp.float32)
    mean = jnp.zeros((c,), jnp.float32)        # PyTorch default running stats
    var = jnp.ones((c,), jnp.float32)
    scale = gamma / jnp.sqrt(var + BN_EPS)
    shift = beta - mean * scale
    return scale.reshape(c, 1), shift.reshape(c, 1)


def init_params(key):
    params = {'mod': [], 'shortcut': [], 'head': None}
    for d in range(DEPTH):
        ni = C_IN if d == 0 else C4
        key, kb, k1, k2, k3, km, kbn = jax.random.split(key, 7)
        wb = jax.random.normal(kb, (NF, ni), jnp.float32) / np.sqrt(ni)
        wc = [jax.random.normal(kk, (NF, NF, k), jnp.float32) / np.sqrt(NF * k)
              for kk, k in zip((k1, k2, k3), KS_LIST)]
        wmcp = jax.random.normal(km, (NF, ni), jnp.float32) / np.sqrt(ni)
        scale, shift = _bn_fold(kbn, C4)
        params['mod'].append(dict(wb=wb, wc=wc, wmcp=wmcp, scale=scale, shift=shift))
    # shortcut 0 (d=2): c_in != 4*nf -> ConvBlock(c_in, 4*nf, 1, act=None)
    key, kw, kbn = jax.random.split(key, 3)
    w0 = jax.random.normal(kw, (C4, C_IN), jnp.float32) / np.sqrt(C_IN)
    s0, t0 = _bn_fold(kbn, C4)
    params['shortcut'].append(dict(w=w0, scale=s0, shift=t0))
    # shortcut 1 (d=5): 4*nf == 4*nf -> BN1d only (identity "conv")
    key, kbn = jax.random.split(key)
    s1, t1 = _bn_fold(kbn, C4)
    params['shortcut'].append(dict(w=jnp.eye(C4, dtype=jnp.float32),
                                   scale=s1, shift=t1))
    # head: Linear(4*nf, c_out) with bias
    key, kw, kb = jax.random.split(key, 3)
    wfc = jax.random.normal(kw, (C_OUT, C4), jnp.float32) / np.sqrt(C4)
    bfc = 0.1 * jax.random.normal(kb, (1, C_OUT), jnp.float32)
    params['head'] = dict(wfc=wfc, bfc=bfc)
    return params


# ------------------------------ pure-JAX reference ----------------------------
def _conv1d_same_ref(x, w_ock):
    k = w_ock.shape[2]
    p = (k - 1) // 2
    return lax.conv_general_dilated(x, w_ock, (1,), [(p, p)],
                                    dimension_numbers=('NCH', 'OIH', 'NCH'))


def _maxpool3_ref(x):
    return lax.reduce_window(x, -jnp.inf, lax.max, (1, 1, 3), (1, 1, 1),
                             ((0, 0), (0, 0), (1, 1)))


def ref_forward(x, params):
    def module(x, p):
        b = _conv1d_same_ref(x, p['wb'][:, :, None])
        outs = [_conv1d_same_ref(b, w) for w in p['wc']]
        outs.append(_conv1d_same_ref(_maxpool3_ref(x), p['wmcp'][:, :, None]))
        y = jnp.concatenate(outs, axis=1)
        y = y * p['scale'][None] + p['shift'][None]
        return jnp.maximum(y, 0.0)

    h = x
    res = x
    for d in range(DEPTH):
        h = module(h, params['mod'][d])
        if d % 3 == 2:
            sp = params['shortcut'][d // 3]
            sc = _conv1d_same_ref(res, sp['w'][:, :, None])
            sc = sc * sp['scale'][None] + sp['shift'][None]
            h = jnp.maximum(h + sc, 0.0)
            res = h
    gap = jnp.mean(h, axis=2)
    logits = gap @ params['head']['wfc'].T + params['head']['bfc']
    return jax.nn.sigmoid(logits)


# ----------------------------------- main --------------------------------------
if __name__ == "__main__":
    key = jax.random.PRNGKey(0)
    pkey, xkey = jax.random.split(key)
    params = init_params(pkey)
    x = jax.random.normal(xkey, (BATCH, C_IN, LEN), jnp.float32)

    forward = make_forward(params)
    out = jax.block_until_ready(forward(x))

    ref = ref_forward(x, params)
    np.testing.assert_allclose(np.asarray(out), np.asarray(ref), rtol=1e-4, atol=1e-5)
    print("KERNEL_OK")
</pallas_src>

<mosaic_0001>
module attributes {stable_mosaic.version = 11 : i64} {
  func.func @_inception_time_kernel(%arg0: memref<32x128xf32, #tpu.memory_space<vmem>>, %arg1: memref<6x72x136xf32, #tpu.memory_space<vmem>>, %arg2: memref<32x9xf32, #tpu.memory_space<vmem>>, %arg3: memref<3x2xf32, #tpu.memory_space<vmem>>) attributes {dimension_semantics = [], scalar_prefetch = 0 : i64, scratch_operands = 0 : i64, tpu.core_type = #tpu.core_type<tc>} {
    %0 = tpu.iota {dimensions = array<i32: 1>} : vector<32x128xi32>
    %c4_i32 = arith.constant 4 : i32
    %1 = vector.broadcast %c4_i32 : i32 to vector<32x128xi32>
    %2 = arith.cmpi sge, %0, %1 : vector<32x128xi32>
    %c20_i32 = arith.constant 20 : i32
    %3 = vector.broadcast %c20_i32 : i32 to vector<32x128xi32>
    %4 = arith.cmpi slt, %0, %3 : vector<32x128xi32>
    %5 = arith.andi %2, %4 : vector<32x128xi1>
    %c4_i32_0 = arith.constant 4 : i32
    %6 = vector.broadcast %c4_i32_0 : i32 to vector<32x128xi32>
    %7 = arith.cmpi eq, %0, %6 : vector<32x128xi32>
    %c19_i32 = arith.constant 19 : i32
    %8 = vector.broadcast %c19_i32 : i32 to vector<32x128xi32>
    %9 = arith.cmpi eq, %0, %8 : vector<32x128xi32>
    %c28_i32 = arith.constant 28 : i32
    %10 = vector.broadcast %c28_i32 : i32 to vector<32x128xi32>
    %11 = arith.cmpi sge, %0, %10 : vector<32x128xi32>
    %c44_i32 = arith.constant 44 : i32
    %12 = vector.broadcast %c44_i32 : i32 to vector<32x128xi32>
    %13 = arith.cmpi slt, %0, %12 : vector<32x128xi32>
    %14 = arith.andi %11, %13 : vector<32x128xi1>
    %c28_i32_1 = arith.constant 28 : i32
    %15 = vector.broadcast %c28_i32_1 : i32 to vector<32x128xi32>
    %16 = arith.cmpi eq, %0, %15 : vector<32x128xi32>
    %c43_i32 = arith.constant 43 : i32
    %17 = vector.broadcast %c43_i32 : i32 to vector<32x128xi32>
    %18 = arith.cmpi eq, %0, %17 : vector<32x128xi32>
    %19 = arith.ori %5, %14 : vector<32x128xi1>
    %20 = arith.ori %7, %16 : vector<32x128xi1>
    %21 = arith.ori %9, %18 : vector<32x128xi1>
    %c0 = arith.constant 0 : index
    %c0_2 = arith.constant 0 : index
    %22 = vector.load %arg2[%c0, %c0_2] : memref<32x9xf32, #tpu.memory_space<vmem>>, vector<32x9xf32>
    %c0_3 = arith.constant 0 : index
    %c0_4 = arith.constant 0 : index
    %23 = vector.load %arg0[%c0_3, %c0_4] : memref<32x128xf32, #tpu.memory_space<vmem>>, vector<32x128xf32>
    %c0_5 = arith.constant 0 : index
    %c0_6 = arith.constant 0 : index
    %c0_7 = arith.constant 0 : index
    %24 = vector.load %arg1[%c0_5, %c0_6, %c0_7] : memref<6x72x136xf32, #tpu.memory_space<vmem>>, vector<1x72x136xf32>
    %25 = vector.shape_cast %24 : vector<1x72x136xf32> to vector<72x136xf32>
    %26 = vector.extract_strided_slice %25 {offsets = [32, 104], sizes = [3, 32], strides = [1, 1]} : vector<72x136xf32> to vector<3x32xf32>
    %27 = vector.extract_strided_slice %25 {offsets = [64, 0], sizes = [8, 32], strides = [1, 1]} : vector<72x136xf32> to vector<8x32xf32>
    %cst = arith.constant dense<0.000000e+00> : vector<8x128xf32>
    %28 = tpu.matmul %27, %23, %cst {dimension_numbers = #tpu.dot_dimension_numbers<[1], [0], [0], [1], [0, 0, 1, 1], [], []>} : vector<8x32xf32>, vector<32x128xf32>, vector<8x128xf32> -> vector<8x128xf32>
    %c4_i32_8 = arith.constant 4 : i32
    %29 = tpu.dynamic_rotate %28 by %c4_i32_8 dim 1 : vector<8x128xf32>, i32 -> vector<8x128xf32>
    %c3_i32 = arith.constant 3 : i32
    %30 = tpu.dynamic_rotate %28 by %c3_i32 dim 1 : vector<8x128xf32>, i32 -> vector<8x128xf32>
    %c2_i32 = arith.constant 2 : i32
    %31 = tpu.dynamic_rotate %28 by %c2_i32 dim 1 : vector<8x128xf32>, i32 -> vector<8x128xf32>
    %c1_i32 = arith.constant 1 : i32
    %32 = tpu.dynamic_rotate %28 by %c1_i32 dim 1 : vector<8x128xf32>, i32 -> vector<8x128xf32>
    %c127_i32 = arith.constant 127 : i32
    %33 = tpu.dynamic_rotate %28 by %c127_i32 dim 1 : vector<8x128xf32>, i32 -> vector<8x128xf32>
    %c126_i32 = arith.constant 126 : i32
    %34 = tpu.dynamic_rotate %28 by %c126_i32 dim 1 : vector<8x128xf32>, i32 -> vector<8x128xf32>
    %c125_i32 = arith.constant 125 : i32
    %35 = tpu.dynamic_rotate %28 by %c125_i32 dim 1 : vector<8x128xf32>, i32 -> vector<8x128xf32>
    %c124_i32 = arith.constant 124 : i32
    %36 = tpu.dynamic_rotate %28 by %c124_i32 dim 1 : vector<8x128xf32>, i32 -> vector<8x128xf32>
    %c1_i32_9 = arith.constant 1 : i32
    %37 = tpu.dynamic_rotate %23 by %c1_i32_9 dim 1 : vector<32x128xf32>, i32 -> vector<32x128xf32>
    %38 = arith.select %20, %23, %37 : vector<32x128xi1>, vector<32x128xf32>
    %c127_i32_10 = arith.constant 127 : i32
    %39 = tpu.dynamic_rotate %23 by %c127_i32_10 dim 1 : vector<32x128xf32>, i32 -> vector<32x128xf32>
    %40 = arith.select %21, %23, %39 : vector<32x128xi1>, vector<32x128xf32>
    %41 = arith.maximumf %38, %23 : vector<32x128xf32>
    %42 = arith.maximumf %41, %40 : vector<32x128xf32>
    %43 = tpu.concatenate %29, %30, %31, %32, %28, %33, %34, %35, %36, %42 in 0 : vector<8x128xf32>, vector<8x128xf32>, vector<8x128xf32>, vector<8x128xf32>, vector<8x128xf32>, vector<8x128xf32>, vector<8x128xf32>, vector<8x128xf32>, vector<8x128xf32>, vector<32x128xf32> -> vector<104x128xf32>
    %44 = vector.extract_strided_slice %22 {offsets = [0, 0], sizes = [32, 1], strides = [1, 1]} : vector<32x9xf32> to vector<32x1xf32>
    %45 = vector.extract_strided_slice %25 {offsets = [0, 0], sizes = [32, 104], strides = [1, 1]} : vector<72x136xf32> to vector<32x104xf32>
    %cst_11 = arith.constant dense<0.000000e+00> : vector<32x128xf32>
    %46 = tpu.matmul %45, %43, %cst_11 {dimension_numbers = #tpu.dot_dimension_numbers<[1], [0], [0], [1], [0, 0, 1, 1], [], []>} : vector<32x104xf32>, vector<104x128xf32>, vector<32x128xf32> -> vector<32x128xf32>
    %47 = vector.broadcast %44 : vector<32x1xf32> to vector<32x128xf32>
    %48 = arith.addf %46, %47 : vector<32x128xf32>
    %cst_12 = arith.constant 0.000000e+00 : f32
    %49 = vector.broadcast %cst_12 : f32 to vector<32x128xf32>
    %50 = arith.maximumf %48, %49 : vector<32x128xf32>
    %cst_13 = arith.constant 0.000000e+00 : f32
    %51 = vector.broadcast %cst_13 : f32 to vector<32x128xf32>
    %52 = arith.select %19, %50, %51 : vector<32x128xi1>, vector<32x128xf32>
    %c1 = arith.constant 1 : index
    %c0_14 = arith.constant 0 : index
    %c0_15 = arith.constant 0 : index
    %53 = vector.load %arg1[%c1, %c0_14, %c0_15] : memref<6x72x136xf32, #tpu.memory_space<vmem>>, vector<1x72x136xf32>
    %54 = vector.shape_cast %53 : vector<1x72x136xf32> to vector<72x136xf32>
    %55 = vector.extract_strided_slice %54 {offsets = [64, 0], sizes = [8, 32], strides = [1, 1]} : vector<72x136xf32> to vector<8x32xf32>
    %cst_16 = arith.constant dense<0.000000e+00> : vector<8x128xf32>
    %56 = tpu.matmul %55, %52, %cst_16 {dimension_numbers = #tpu.dot_dimension_numbers<[1], [0], [0], [1], [0, 0, 1, 1], [], []>} : vector<8x32xf32>, vector<32x128xf32>, vector<8x128xf32> -> vector<8x128xf32>
    %c4_i32_17 = arith.constant 4 : i32
    %57 = tpu.dynamic_rotate %56 by %c4_i32_17 dim 1 : vector<8x128xf32>, i32 -> vector<8x128xf32>
    %c3_i32_18 = arith.constant 3 : i32
    %58 = tpu.dynamic_rotate %56 by %c3_i32_18 dim 1 : vector<8x128xf32>, i32 -> vector<8x128xf32>
    %c2_i32_19 = arith.constant 2 : i32
    %59 = tpu.dynamic_rotate %56 by %c2_i32_19 dim 1 : vector<8x128xf32>, i32 -> vector<8x128xf32>
    %c1_i32_20 = arith.constant 1 : i32
    %60 = tpu.dynamic_rotate %56 by %c1_i32_20 dim 1 : vector<8x128xf32>, i32 -> vector<8x128xf32>
    %c127_i32_21 = arith.constant 127 : i32
    %61 = tpu.dynamic_rotate %56 by %c127_i32_21 dim 1 : vector<8x128xf32>, i32 -> vector<8x128xf32>
    %c126_i32_22 = arith.constant 126 : i32
    %62 = tpu.dynamic_rotate %56 by %c126_i32_22 dim 1 : vector<8x128xf32>, i32 -> vector<8x128xf32>
    %c125_i32_23 = arith.constant 125 : i32
    %63 = tpu.dynamic_rotate %56 by %c125_i32_23 dim 1 : vector<8x128xf32>, i32 -> vector<8x128xf32>
    %c124_i32_24 = arith.constant 124 : i32
    %64 = tpu.dynamic_rotate %56 by %c124_i32_24 dim 1 : vector<8x128xf32>, i32 -> vector<8x128xf32>
    %c1_i32_25 = arith.constant 1 : i32
    %65 = tpu.dynamic_rotate %52 by %c1_i32_25 dim 1 : vector<32x128xf32>, i32 -> vector<32x128xf32>
    %66 = arith.select %20, %52, %65 : vector<32x128xi1>, vector<32x128xf32>
    %c127_i32_26 = arith.constant 127 : i32
    %67 = tpu.dynamic_rotate %52 by %c127_i32_26 dim 1 : vector<32x128xf32>, i32 -> vector<32x128xf32>
    %68 = arith.select %21, %52, %67 : vector<32x128xi1>, vector<32x128xf32>
    %69 = arith.maximumf %66, %52 : vector<32x128xf32>
    %70 = arith.maximumf %69, %68 : vector<32x128xf32>
    %71 = tpu.concatenate %57, %58, %59, %60, %56, %61, %62, %63, %64, %70 in 0 : vector<8x128xf32>, vector<8x128xf32>, vector<8x128xf32>, vector<8x128xf32>, vector<8x128xf32>, vector<8x128xf32>, vector<8x128xf32>, vector<8x128xf32>, vector<8x128xf32>, vector<32x128xf32> -> vector<104x128xf32>
    %72 = vector.extract_strided_slice %22 {offsets = [0, 1], sizes = [32, 1], strides = [1, 1]} : vector<32x9xf32> to vector<32x1xf32>
    %73 = vector.extract_strided_slice %54 {offsets = [0, 0], sizes = [32, 104], strides = [1, 1]} : vector<72x136xf32> to vector<32x104xf32>
    %cst_27 = arith.constant dense<0.000000e+00> : vector<32x128xf32>
    %74 = tpu.matmul %73, %71, %cst_27 {dimension_numbers = #tpu.dot_dimension_numbers<[1], [0], [0], [1], [0, 0, 1, 1], [], []>} : vector<32x104xf32>, vector<104x128xf32>, vector<32x128xf32> -> vector<32x128xf32>
    %75 = vector.broadcast %72 : vector<32x1xf32> to vector<32x128xf32>
    %76 = arith.addf %74, %75 : vector<32x128xf32>
    %cst_28 = arith.constant 0.000000e+00 : f32
    %77 = vector.broadcast %cst_28 : f32 to vector<32x128xf32>
    %78 = arith.maximumf %76, %77 : vector<32x128xf32>
    %cst_29 = arith.constant 0.000000e+00 : f32
    %79 = vector.broadcast %cst_29 : f32 to vector<32x128xf32>
    %80 = arith.select %19, %78, %79 : vector<32x128xi1>, vector<32x128xf32>
    %c2 = arith.constant 2 : index
    %c0_30 = arith.constant 0 : index
    %c0_31 = arith.constant 0 : index
    %81 = vector.load %arg1[%c2, %c0_30, %c0_31] : memref<6x72x136xf32, #tpu.memory_space<vmem>>, vector<1x72x136xf32>
    %82 = vector.shape_cast %81 : vector<1x72x136xf32> to vector<72x136xf32>
    %83 = vector.extract_strided_slice %82 {offsets = [64, 0], sizes = [8, 32], strides = [1, 1]} : vector<72x136xf32> to vector<8x32xf32>
    %cst_32 = arith.constant dense<0.000000e+00> : vector<8x128xf32>
    %84 = tpu.matmul %83, %80, %cst_32 {dimension_numbers = #tpu.dot_dimension_numbers<[1], [0], [0], [1], [0, 0, 1, 1], [], []>} : vector<8x32xf32>, vector<32x128xf32>, vector<8x128xf32> -> vector<8x128xf32>
    %c4_i32_33 = arith.constant 4 : i32
    %85 = tpu.dynamic_rotate %84 by %c4_i32_33 dim 1 : vector<8x128xf32>, i32 -> vector<8x128xf32>
    %c3_i32_34 = arith.constant 3 : i32
    %86 = tpu.dynamic_rotate %84 by %c3_i32_34 dim 1 : vector<8x128xf32>, i32 -> vector<8x128xf32>
    %c2_i32_35 = arith.constant 2 : i32
    %87 = tpu.dynamic_rotate %84 by %c2_i32_35 dim 1 : vector<8x128xf32>, i32 -> vector<8x128xf32>
    %c1_i32_36 = arith.constant 1 : i32
    %88 = tpu.dynamic_rotate %84 by %c1_i32_36 dim 1 : vector<8x128xf32>, i32 -> vector<8x128xf32>
    %c127_i32_37 = arith.constant 127 : i32
    %89 = tpu.dynamic_rotate %84 by %c127_i32_37 dim 1 : vector<8x128xf32>, i32 -> vector<8x128xf32>
    %c126_i32_38 = arith.constant 126 : i32
    %90 = tpu.dynamic_rotate %84 by %c126_i32_38 dim 1 : vector<8x128xf32>, i32 -> vector<8x128xf32>
    %c125_i32_39 = arith.constant 125 : i32
    %91 = tpu.dynamic_rotate %84 by %c125_i32_39 dim 1 : vector<8x128xf32>, i32 -> vector<8x128xf32>
    %c124_i32_40 = arith.constant 124 : i32
    %92 = tpu.dynamic_rotate %84 by %c124_i32_40 dim 1 : vector<8x128xf32>, i32 -> vector<8x128xf32>
    %c1_i32_41 = arith.constant 1 : i32
    %93 = tpu.dynamic_rotate %80 by %c1_i32_41 dim 1 : vector<32x128xf32>, i32 -> vector<32x128xf32>
    %94 = arith.select %20, %80, %93 : vector<32x128xi1>, vector<32x128xf32>
    %c127_i32_42 = arith.constant 127 : i32
    %95 = tpu.dynamic_rotate %80 by %c127_i32_42 dim 1 : vector<32x128xf32>, i32 -> vector<32x128xf32>
    %96 = arith.select %21, %80, %95 : vector<32x128xi1>, vector<32x128xf32>
    %97 = arith.maximumf %94, %80 : vector<32x128xf32>
    %98 = arith.maximumf %97, %96 : vector<32x128xf32>
    %99 = tpu.concatenate %85, %86, %87, %88, %84, %89, %90, %91, %92, %98 in 0 : vector<8x128xf32>, vector<8x128xf32>, vector<8x128xf32>, vector<8x128xf32>, vector<8x128xf32>, vector<8x128xf32>, vector<8x128xf32>, vector<8x128xf32>, vector<8x128xf32>, vector<32x128xf32> -> vector<104x128xf32>
    %100 = vector.extract_strided_slice %22 {offsets = [0, 2], sizes = [32, 1], strides = [1, 1]} : vector<32x9xf32> to vector<32x1xf32>
    %101 = tpu.concatenate %99, %23 in 0 : vector<104x128xf32>, vector<32x128xf32> -> vector<136x128xf32>
    %102 = vector.extract_strided_slice %82 {offsets = [0, 0], sizes = [64, 136], strides = [1, 1]} : vector<72x136xf32> to vector<64x136xf32>
    %cst_43 = arith.constant dense<0.000000e+00> : vector<64x128xf32>
    %103 = tpu.matmul %102, %101, %cst_43 {dimension_numbers = #tpu.dot_dimension_numbers<[1], [0], [0], [1], [0, 0, 1, 1], [], []>} : vector<64x136xf32>, vector<136x128xf32>, vector<64x128xf32> -> vector<64x128xf32>
    %104 = vector.extract_strided_slice %103 {offsets = [0, 0], sizes = [32, 128], strides = [1, 1]} : vector<64x128xf32> to vector<32x128xf32>
    %105 = vector.broadcast %100 : vector<32x1xf32> to vector<32x128xf32>
    %106 = arith.addf %104, %105 : vector<32x128xf32>
    %cst_44 = arith.constant 0.000000e+00 : f32
    %107 = vector.broadcast %cst_44 : f32 to vector<32x128xf32>
    %108 = arith.maximumf %106, %107 : vector<32x128xf32>
    %109 = vector.extract_strided_slice %103 {offsets = [32, 0], sizes = [32, 128], strides = [1, 1]} : vector<64x128xf32> to vector<32x128xf32>
    %110 = arith.addf %108, %109 : vector<32x128xf32>
    %111 = vector.extract_strided_slice %22 {offsets = [0, 6], sizes = [32, 1], strides = [1, 1]} : vector<32x9xf32> to vector<32x1xf32>
    %112 = vector.broadcast %111 : vector<32x1xf32> to vector<32x128xf32>
    %113 = arith.addf %110, %112 : vector<32x128xf32>
    %cst_45 = arith.constant 0.000000e+00 : f32
    %114 = vector.broadcast %cst_45 : f32 to vector<32x128xf32>
    %115 = arith.maximumf %113, %114 : vector<32x128xf32>
    %cst_46 = arith.constant 0.000000e+00 : f32
    %116 = vector.broadcast %cst_46 : f32 to vector<32x128xf32>
    %117 = arith.select %19, %115, %116 : vector<32x128xi1>, vector<32x128xf32>
    %c3 = arith.constant 3 : index
    %c0_47 = arith.constant 0 : index
    %c0_48 = arith.constant 0 : index
    %118 = vector.load %arg1[%c3, %c0_47, %c0_48] : memref<6x72x136xf32, #tpu.memory_space<vmem>>, vector<1x72x136xf32>
    %119 = vector.shape_cast %118 : vector<1x72x136xf32> to vector<72x136xf32>
    %120 = vector.extract_strided_slice %119 {offsets = [64, 0], sizes = [8, 32], strides = [1, 1]} : vector<72x136xf32> to vector<8x32xf32>
    %cst_49 = arith.constant dense<0.000000e+00> : vector<8x128xf32>
    %121 = tpu.matmul %120, %117, %cst_49 {dimension_numbers = #tpu.dot_dimension_numbers<[1], [0], [0], [1], [0, 0, 1, 1], [], []>} : vector<8x32xf32>, vector<32x128xf32>, vector<8x128xf32> -> vector<8x128xf32>
    %c4_i32_50 = arith.constant 4 : i32
    %122 = tpu.dynamic_rotate %121 by %c4_i32_50 dim 1 : vector<8x128xf32>, i32 -> vector<8x128xf32>
    %c3_i32_51 = arith.constant 3 : i32
    %123 = tpu.dynamic_rotate %121 by %c3_i32_51 dim 1 : vector<8x128xf32>, i32 -> vector<8x128xf32>
    %c2_i32_52 = arith.constant 2 : i32
    %124 = tpu.dynamic_rotate %121 by %c2_i32_52 dim 1 : vector<8x128xf32>, i32 -> vector<8x128xf32>
    %c1_i32_53 = arith.constant 1 : i32
    %125 = tpu.dynamic_rotate %121 by %c1_i32_53 dim 1 : vector<8x128xf32>, i32 -> vector<8x128xf32>
    %c127_i32_54 = arith.constant 127 : i32
    %126 = tpu.dynamic_rotate %121 by %c127_i32_54 dim 1 : vector<8x128xf32>, i32 -> vector<8x128xf32>
    %c126_i32_55 = arith.constant 126 : i32
    %127 = tpu.dynamic_rotate %121 by %c126_i32_55 dim 1 : vector<8x128xf32>, i32 -> vector<8x128xf32>
    %c125_i32_56 = arith.constant 125 : i32
    %128 = tpu.dynamic_rotate %121 by %c125_i32_56 dim 1 : vector<8x128xf32>, i32 -> vector<8x128xf32>
    %c124_i32_57 = arith.constant 124 : i32
    %129 = tpu.dynamic_rotate %121 by %c124_i32_57 dim 1 : vector<8x128xf32>, i32 -> vector<8x128xf32>
    %c1_i32_58 = arith.constant 1 : i32
    %130 = tpu.dynamic_rotate %117 by %c1_i32_58 dim 1 : vector<32x128xf32>, i32 -> vector<32x128xf32>
    %131 = arith.select %20, %117, %130 : vector<32x128xi1>, vector<32x128xf32>
    %c127_i32_59 = arith.constant 127 : i32
    %132 = tpu.dynamic_rotate %117 by %c127_i32_59 dim 1 : vector<32x128xf32>, i32 -> vector<32x128xf32>
    %133 = arith.select %21, %117, %132 : vector<32x128xi1>, vector<32x128xf32>
    %134 = arith.maximumf %131, %117 : vector<32x128xf32>
    %135 = arith.maximumf %134, %133 : vector<32x128xf32>
    %136 = tpu.concatenate %122, %123, %124, %125, %121, %126, %127, %128, %129, %135 in 0 : vector<8x128xf32>, vector<8x128xf32>, vector<8x128xf32>, vector<8x128xf32>, vector<8x128xf32>, vector<8x128xf32>, vector<8x128xf32>, vector<8x128xf32>, vector<8x128xf32>, vector<32x128xf32> -> vector<104x128xf32>
    %137 = vector.extract_strided_slice %22 {offsets = [0, 3], sizes = [32, 1], strides = [1, 1]} : vector<32x9xf32> to vector<32x1xf32>
    %138 = vector.extract_strided_slice %119 {offsets = [0, 0], sizes = [32, 104], strides = [1, 1]} : vector<72x136xf32> to vector<32x104xf32>
    %cst_60 = arith.constant dense<0.000000e+00> : vector<32x128xf32>
    %139 = tpu.matmul %138, %136, %cst_60 {dimension_numbers = #tpu.dot_dimension_numbers<[1], [0], [0], [1], [0, 0, 1, 1], [], []>} : vector<32x104xf32>, vector<104x128xf32>, vector<32x128xf32> -> vector<32x128xf32>
    %140 = vector.broadcast %137 : vector<32x1xf32> to vector<32x128xf32>
    %141 = arith.addf %139, %140 : vector<32x128xf32>
    %cst_61 = arith.constant 0.000000e+00 : f32
    %142 = vector.broadcast %cst_61 : f32 to vector<32x128xf32>
    %143 = arith.maximumf %141, %142 : vector<32x128xf32>
    %cst_62 = arith.constant 0.000000e+00 : f32
    %144 = vector.broadcast %cst_62 : f32 to vector<32x128xf32>
    %145 = arith.select %19, %143, %144 : vector<32x128xi1>, vector<32x128xf32>
    %c4 = arith.constant 4 : index
    %c0_63 = arith.constant 0 : index
    %c0_64 = arith.constant 0 : index
    %146 = vector.load %arg1[%c4, %c0_63, %c0_64] : memref<6x72x136xf32, #tpu.memory_space<vmem>>, vector<1x72x136xf32>
    %147 = vector.shape_cast %146 : vector<1x72x136xf32> to vector<72x136xf32>
    %148 = vector.extract_strided_slice %147 {offsets = [64, 0], sizes = [8, 32], strides = [1, 1]} : vector<72x136xf32> to vector<8x32xf32>
    %cst_65 = arith.constant dense<0.000000e+00> : vector<8x128xf32>
    %149 = tpu.matmul %148, %145, %cst_65 {dimension_numbers = #tpu.dot_dimension_numbers<[1], [0], [0], [1], [0, 0, 1, 1], [], []>} : vector<8x32xf32>, vector<32x128xf32>, vector<8x128xf32> -> vector<8x128xf32>
    %c4_i32_66 = arith.constant 4 : i32
    %150 = tpu.dynamic_rotate %149 by %c4_i32_66 dim 1 : vector<8x128xf32>, i32 -> vector<8x128xf32>
    %c3_i32_67 = arith.constant 3 : i32
    %151 = tpu.dynamic_rotate %149 by %c3_i32_67 dim 1 : vector<8x128xf32>, i32 -> vector<8x128xf32>
    %c2_i32_68 = arith.constant 2 : i32
    %152 = tpu.dynamic_rotate %149 by %c2_i32_68 dim 1 : vector<8x128xf32>, i32 -> vector<8x128xf32>
    %c1_i32_69 = arith.constant 1 : i32
    %153 = tpu.dynamic_rotate %149 by %c1_i32_69 dim 1 : vector<8x128xf32>, i32 -> vector<8x128xf32>
    %c127_i32_70 = arith.constant 127 : i32
    %154 = tpu.dynamic_rotate %149 by %c127_i32_70 dim 1 : vector<8x128xf32>, i32 -> vector<8x128xf32>
    %c126_i32_71 = arith.constant 126 : i32
    %155 = tpu.dynamic_rotate %149 by %c126_i32_71 dim 1 : vector<8x128xf32>, i32 -> vector<8x128xf32>
    %c125_i32_72 = arith.constant 125 : i32
    %156 = tpu.dynamic_rotate %149 by %c125_i32_72 dim 1 : vector<8x128xf32>, i32 -> vector<8x128xf32>
    %c124_i32_73 = arith.constant 124 : i32
    %157 = tpu.dynamic_rotate %149 by %c124_i32_73 dim 1 : vector<8x128xf32>, i32 -> vector<8x128xf32>
    %c1_i32_74 = arith.constant 1 : i32
    %158 = tpu.dynamic_rotate %145 by %c1_i32_74 dim 1 : vector<32x128xf32>, i32 -> vector<32x128xf32>
    %159 = arith.select %20, %145, %158 : vector<32x128xi1>, vector<32x128xf32>
    %c127_i32_75 = arith.constant 127 : i32
    %160 = tpu.dynamic_rotate %145 by %c127_i32_75 dim 1 : vector<32x128xf32>, i32 -> vector<32x128xf32>
    %161 = arith.select %21, %145, %160 : vector<32x128xi1>, vector<32x128xf32>
    %162 = arith.maximumf %159, %145 : vector<32x128xf32>
    %163 = arith.maximumf %162, %161 : vector<32x128xf32>
    %164 = tpu.concatenate %150, %151, %152, %153, %149, %154, %155, %156, %157, %163 in 0 : vector<8x128xf32>, vector<8x128xf32>, vector<8x128xf32>, vector<8x128xf32>, vector<8x128xf32>, vector<8x128xf32>, vector<8x128xf32>, vector<8x128xf32>, vector<8x128xf32>, vector<32x128xf32> -> vector<104x128xf32>
    %165 = vector.extract_strided_slice %22 {offsets = [0, 4], sizes = [32, 1], strides = [1, 1]} : vector<32x9xf32> to vector<32x1xf32>
    %166 = vector.extract_strided_slice %147 {offsets = [0, 0], sizes = [32, 104], strides = [1, 1]} : vector<72x136xf32> to vector<32x104xf32>
    %cst_76 = arith.constant dense<0.000000e+00> : vector<32x128xf32>
    %167 = tpu.matmul %166, %164, %cst_76 {dimension_numbers = #tpu.dot_dimension_numbers<[1], [0], [0], [1], [0, 0, 1, 1], [], []>} : vector<32x104xf32>, vector<104x128xf32>, vector<32x128xf32> -> vector<32x128xf32>
    %168 = vector.broadcast %165 : vector<32x1xf32> to vector<32x128xf32>
    %169 = arith.addf %167, %168 : vector<32x128xf32>
    %cst_77 = arith.constant 0.000000e+00 : f32
    %170 = vector.broadcast %cst_77 : f32 to vector<32x128xf32>
    %171 = arith.maximumf %169, %170 : vector<32x128xf32>
    %cst_78 = arith.constant 0.000000e+00 : f32
    %172 = vector.broadcast %cst_78 : f32 to vector<32x128xf32>
    %173 = arith.select %19, %171, %172 : vector<32x128xi1>, vector<32x128xf32>
    %c5 = arith.constant 5 : index
    %c0_79 = arith.constant 0 : index
    %c0_80 = arith.constant 0 : index
    %174 = vector.load %arg1[%c5, %c0_79, %c0_80] : memref<6x72x136xf32, #tpu.memory_space<vmem>>, vector<1x72x136xf32>
    %175 = vector.shape_cast %174 : vector<1x72x136xf32> to vector<72x136xf32>
    %176 = vector.extract_strided_slice %175 {offsets = [64, 0], sizes = [8, 32], strides = [1, 1]} : vector<72x136xf32> to vector<8x32xf32>
    %cst_81 = arith.constant dense<0.000000e+00> : vector<8x128xf32>
    %177 = tpu.matmul %176, %173, %cst_81 {dimension_numbers = #tpu.dot_dimension_numbers<[1], [0], [0], [1], [0, 0, 1, 1], [], []>} : vector<8x32xf32>, vector<32x128xf32>, vector<8x128xf32> -> vector<8x128xf32>
    %c4_i32_82 = arith.constant 4 : i32
    %178 = tpu.dynamic_rotate %177 by %c4_i32_82 dim 1 : vector<8x128xf32>, i32 -> vector<8x128xf32>
    %c3_i32_83 = arith.constant 3 : i32
    %179 = tpu.dynamic_rotate %177 by %c3_i32_83 dim 1 : vector<8x128xf32>, i32 -> vector<8x128xf32>
    %c2_i32_84 = arith.constant 2 : i32
    %180 = tpu.dynamic_rotate %177 by %c2_i32_84 dim 1 : vector<8x128xf32>, i32 -> vector<8x128xf32>
    %c1_i32_85 = arith.constant 1 : i32
    %181 = tpu.dynamic_rotate %177 by %c1_i32_85 dim 1 : vector<8x128xf32>, i32 -> vector<8x128xf32>
    %c127_i32_86 = arith.constant 127 : i32
    %182 = tpu.dynamic_rotate %177 by %c127_i32_86 dim 1 : vector<8x128xf32>, i32 -> vector<8x128xf32>
    %c126_i32_87 = arith.constant 126 : i32
    %183 = tpu.dynamic_rotate %177 by %c126_i32_87 dim 1 : vector<8x128xf32>, i32 -> vector<8x128xf32>
    %c125_i32_88 = arith.constant 125 : i32
    %184 = tpu.dynamic_rotate %177 by %c125_i32_88 dim 1 : vector<8x128xf32>, i32 -> vector<8x128xf32>
    %c124_i32_89 = arith.constant 124 : i32
    %185 = tpu.dynamic_rotate %177 by %c124_i32_89 dim 1 : vector<8x128xf32>, i32 -> vector<8x128xf32>
    %c1_i32_90 = arith.constant 1 : i32
    %186 = tpu.dynamic_rotate %173 by %c1_i32_90 dim 1 : vector<32x128xf32>, i32 -> vector<32x128xf32>
    %187 = arith.select %20, %173, %186 : vector<32x128xi1>, vector<32x128xf32>
    %c127_i32_91 = arith.constant 127 : i32
    %188 = tpu.dynamic_rotate %173 by %c127_i32_91 dim 1 : vector<32x128xf32>, i32 -> vector<32x128xf32>
    %189 = arith.select %21, %173, %188 : vector<32x128xi1>, vector<32x128xf32>
    %190 = arith.maximumf %187, %173 : vector<32x128xf32>
    %191 = arith.maximumf %190, %189 : vector<32x128xf32>
    %192 = tpu.concatenate %178, %179, %180, %181, %177, %182, %183, %184, %185, %191 in 0 : vector<8x128xf32>, vector<8x128xf32>, vector<8x128xf32>, vector<8x128xf32>, vector<8x128xf32>, vector<8x128xf32>, vector<8x128xf32>, vector<8x128xf32>, vector<8x128xf32>, vector<32x128xf32> -> vector<104x128xf32>
    %193 = vector.extract_strided_slice %22 {offsets = [0, 5], sizes = [32, 1], strides = [1, 1]} : vector<32x9xf32> to vector<32x1xf32>
    %194 = tpu.concatenate %192, %117 in 0 : vector<104x128xf32>, vector<32x128xf32> -> vector<136x128xf32>
    %195 = vector.extract_strided_slice %175 {offsets = [0, 0], sizes = [64, 136], strides = [1, 1]} : vector<72x136xf32> to vector<64x136xf32>
    %cst_92 = arith.constant dense<0.000000e+00> : vector<64x128xf32>
    %196 = tpu.matmul %195, %194, %cst_92 {dimension_numbers = #tpu.dot_dimension_numbers<[1], [0], [0], [1], [0, 0, 1, 1], [], []>} : vector<64x136xf32>, vector<136x128xf32>, vector<64x128xf32> -> vector<64x128xf32>
    %197 = vector.extract_strided_slice %196 {offsets = [0, 0], sizes = [32, 128], strides = [1, 1]} : vector<64x128xf32> to vector<32x128xf32>
    %198 = vector.broadcast %193 : vector<32x1xf32> to vector<32x128xf32>
    %199 = arith.addf %197, %198 : vector<32x128xf32>
    %cst_93 = arith.constant 0.000000e+00 : f32
    %200 = vector.broadcast %cst_93 : f32 to vector<32x128xf32>
    %201 = arith.maximumf %199, %200 : vector<32x128xf32>
    %202 = vector.extract_strided_slice %196 {offsets = [32, 0], sizes = [32, 128], strides = [1, 1]} : vector<64x128xf32> to vector<32x128xf32>
    %203 = arith.addf %201, %202 : vector<32x128xf32>
    %204 = vector.extract_strided_slice %22 {offsets = [0, 7], sizes = [32, 1], strides = [1, 1]} : vector<32x9xf32> to vector<32x1xf32>
    %205 = vector.broadcast %204 : vector<32x1xf32> to vector<32x128xf32>
    %206 = arith.addf %203, %205 : vector<32x128xf32>
    %cst_94 = arith.constant 0.000000e+00 : f32
    %207 = vector.broadcast %cst_94 : f32 to vector<32x128xf32>
    %208 = arith.maximumf %206, %207 : vector<32x128xf32>
    %cst_95 = arith.constant 0.000000e+00 : f32
    %209 = vector.broadcast %cst_95 : f32 to vector<32x128xf32>
    %210 = arith.select %19, %208, %209 : vector<32x128xi1>, vector<32x128xf32>
    %211 = tpu.iota {dimensions = array<i32: 0>} : vector<128x2xi32>
    %212 = tpu.iota {dimensions = array<i32: 1>} : vector<128x2xi32>
    %c24_i32 = arith.constant 24 : i32
    %213 = vector.broadcast %c24_i32 : i32 to vector<128x2xi32>
    %214 = arith.muli %212, %213 : vector<128x2xi32>
    %c4_i32_96 = arith.constant 4 : i32
    %215 = vector.broadcast %c4_i32_96 : i32 to vector<128x2xi32>
    %216 = arith.addi %214, %215 : vector<128x2xi32>
    %217 = arith.cmpi sge, %211, %216 : vector<128x2xi32>
    %c16_i32 = arith.constant 16 : i32
    %218 = vector.broadcast %c16_i32 : i32 to vector<128x2xi32>
    %219 = arith.addi %216, %218 : vector<128x2xi32>
    %220 = arith.cmpi slt, %211, %219 : vector<128x2xi32>
    %221 = arith.andi %217, %220 : vector<128x2xi1>
    %cst_97 = arith.constant 6.250000e-02 : f32
    %cst_98 = arith.constant 0.000000e+00 : f32
    %222 = vector.broadcast %cst_97 : f32 to vector<128x2xf32>
    %223 = vector.broadcast %cst_98 : f32 to vector<128x2xf32>
    %224 = arith.select %221, %222, %223 : vector<128x2xi1>, vector<128x2xf32>
    %cst_99 = arith.constant dense<0.000000e+00> : vector<32x2xf32>
    %225 = tpu.matmul %210, %224, %cst_99 {dimension_numbers = #tpu.dot_dimension_numbers<[1], [0], [0], [1], [0, 0, 1, 1], [], []>} : vector<32x128xf32>, vector<128x2xf32>, vector<32x2xf32> -> vector<32x2xf32>
    %cst_100 = arith.constant dense<0.000000e+00> : vector<3x2xf32>
    %226 = tpu.matmul %26, %225, %cst_100 {dimension_numbers = #tpu.dot_dimension_numbers<[1], [0], [0], [1], [0, 0, 1, 1], [], []>} : vector<3x32xf32>, vector<32x2xf32>, vector<3x2xf32> -> vector<3x2xf32>
    %227 = vector.extract_strided_slice %22 {offsets = [0, 8], sizes = [3, 1], strides = [1, 1]} : vector<32x9xf32> to vector<3x1xf32>
    %228 = vector.broadcast %227 : vector<3x1xf32> to vector<3x2xf32>
    %229 = arith.addf %226, %228 : vector<3x2xf32>
    %230 = arith.negf %229 : vector<3x2xf32>
    %231 = math.exp %230 : vector<3x2xf32>
    %cst_101 = arith.constant 1.000000e+00 : f32
    %232 = vector.broadcast %cst_101 : f32 to vector<3x2xf32>
    %233 = arith.addf %232, %231 : vector<3x2xf32>
    %234 = arith.divf %232, %233 : vector<3x2xf32>
    %c0_102 = arith.constant 0 : index
    %c0_103 = arith.constant 0 : index
    %235 = vector.load %arg3[%c0_102, %c0_103] : memref<3x2xf32, #tpu.memory_space<vmem>>, vector<3x2xf32>
    tpu.vector_store %arg3[%c0_102, %c0_103], %234 {strides = array<i32>} : memref<3x2xf32, #tpu.memory_space<vmem>>, vector<3x2xf32>,
    return
  }
}

</mosaic_0001>

<bundles_post_ra>
// kernel: _forward_jit.1
= control target key start
LH: loop header
LB: loop body
LE: loop exit
PB: predicated region body
PF: predicated region fallthrough
CT: control target
= control target key end

     0   :  { %v2495_v0 = vmov 0.0   ;;  %vm2496_vm0 = vmmov 0   ;;  %s2497_s16 = smov 1   ;;  %s2498_s19 = smov 127   ;;  %vm44_vm1 = vcmask 261120   ;;  %v14_v6 = vlaneseq  ;;  %s3371_s0 = inlined_call_operand.vmem [shape: f32[32,128], index: 0, kind: input, shape index: {}]   ;;  %s3372_s1 = inlined_call_operand.vmem [shape: f32[6,72,136], index: 1, kind: input, shape index: {}]   ;;  %s3373_s2 = inlined_call_operand.vmem [shape: f32[32,9], index: 2, kind: input, shape index: {}]   ;;  %s3374_s3 = inlined_call_operand.vmem [shape: f32[3,2], index: 3, kind: output, shape index: {}]  }
   0x1   :  { %2206 = vmatprep.subr.mxu1 %v2495_v0  ;;  %v2540_v1 = vld [vmem:[%s3371_s0 + $0x18] sm:$0xff]  ;;  %v2545_v2 = vld [vmem:[%s3371_s0 + $0x10] sm:$0xff]  ;;  %2214 = vmatprep.mubr.msk.f32.mxu1 %vm2496_vm0, %v2495_v0  ;;  %v2556_v3 = vld [vmem:[%s3371_s0 + $0x8] sm:$0xff]  ;;  %s2500_s24 = smov 124   ;;  %vm186_vm8 = vcmask 850944   ;;  %s2501_s27 = smov 126  }
   0x2   :  { %2207 = vmatpush3.msra.mxu1 %v2540_v1  ;;  %140 = vrot.lane.b32.xlu0 %v2540_v1, %s2497_s16  ;;  %v2566_v4 = vld [vmem:[%s3371_s0] sm:$0xff]  ;;  %v2590_v7 = vand.u32 127, %v14_v6  ;;  %s2499_s0 = smov 125   ;;  %s2502_s28 = smov 2   ;;  %v2503_v37 = vmov 0   ;;  %v2647_v38 = vld [vmem:[%s3373_s2 + $0x10] sm:$0xff] }
   0x3   :  { %2208 = vmatprep.subr.mxu1 %v2495_v0  ;;  %152 = vrot.lane.b32.xlu1 %v2540_v1, %s2498_s19  ;;  %v43_v5 = vld [vmem:[%s3372_s1 + $0x80] sm:$0xff]  ;;  %s2504_s29 = smov 4   ;;  %s2505_s30 = smov 3   ;;  %v2652_v39 = vld [vmem:[%s3373_s2 + $0x18] sm:$0xff]  ;;  %v2659_v40 = vld [vmem:[%s3373_s2 + $0x8] sm:$0xff] }
   0x4   :  { %2209 = vmatpush3.msra.mxu1 %v2545_v2  ;;  %2249 = vmatprep.subr.mxu0 %v2495_v0  ;;  %vm19_vm2 = vcmp.eq.s32.totalorder %v2590_v7, 4  ;;  %vm24_vm3 = vcmp.eq.s32.totalorder %v2590_v7, 28  ;;  %vm20_vm4 = vcmp.eq.s32.totalorder %v2590_v7, 19  ;;  %vm25_vm5 = vcmp.eq.s32.totalorder %v2590_v7, 43  ;;  %v37_v36 = vld [vmem:[%s3372_s1] sm:$0xff]  ;;  %v38_v50 = vld [vmem:[%s3372_s1 + $0x10] sm:$0xff] }
   0x5   :  { %2210 = vmatprep.subr.mxu1 %v2495_v0  ;;  %2257 = vmatprep.mubr.msk.f32.mxu0 %vm2496_vm0, %v2495_v0  ;;  %vm2596_vm6 = vmor %vm19_vm2, %vm24_vm3  ;;  %v2664_v41 = vld [vmem:[%s3373_s2] sm:$0xff]  ;;  %v40_v52 = vld [vmem:[%s3372_s1 + $0x30] sm:$0xff]  ;;  %vm16_vm9 = vcmp.ge.s32.totalorder %v2590_v7, 4  ;;  %vm17_vm10 = vcmp.lt.s32.totalorder %v2590_v7, 20  ;;  %vm21_vm11 = vcmp.ge.s32.totalorder %v2590_v7, 28  ;;  %vm22_vm12 = vcmp.lt.s32.totalorder %v2590_v7, 44 }
   0x6   :  { %2211 = vmatpush3.msra.mxu1 %v2556_v3  ;;  %138 = vrot.lane.b32.xlu0 %v2545_v2, %s2497_s16  ;;  %vm2600_vm7 = vmor %vm20_vm4, %vm25_vm5  ;;  %v39_v51 = vld [vmem:[%s3372_s1 + $0x20] sm:$0xff]  ;;  %vm679_vm2 = vcmask 64512   ;;  %v2028_v9 = vld [vmem:[%s3372_s1 + $0x2d8] sm:$0xff] }
   0x7   :  { %2212 = vmatprep.subr.mxu1 %v2495_v0  ;;  %136 = vrot.lane.b32.xlu1 %v2556_v3, %s2497_s16  ;;  %vm18_vm13 = vmand %vm16_vm9, %vm17_vm10 }
   0x8   :  { %2213 = vmatpush3.msra.mxu1 %v2566_v4  ;;  %2471 = vset.pattern.permute.xlu1 %v2503_v37  ;;  %vm23_vm14 = vmand %vm21_vm11, %vm22_vm12 }
   0x9   :  { %2215 = vmatmul.mubr.msk.f32.vlgmr.msra.gmra.mxu1 %vm44_vm1, %v43_v5  ;;  %2470 = vset.pattern.permute.xlu0 %v2503_v37  ;;  %vm2687_vm15 = vmor %vm18_vm13, %vm23_vm14 }
   0xa   :  { %150 = vrot.lane.b32.xlu0 %v2545_v2, %s2498_s19  ;;  %2243 = vmatprep.mubr.msk.f32.mxu1 %vm186_vm8, %v37_v36 }
   0xb   :  { %134 = vrot.lane.b32.xlu1 %v2566_v4, %s2497_s16 }
   0xe   :  { %148 = vrot.lane.b32.xlu0 %v2556_v3, %s2498_s19 }
   0xf   :  { %146 = vrot.lane.b32.xlu1 %v2566_v4, %s2498_s19 }
  0x74   :  { %v141_v10 = vpop.permute.xlu0 %140 }
  0x75   :  { %v145_v11 = vsel %vm2596_vm6, %v2540_v1, %v141_v10  ;;  %v153_v12 = vpop.permute.xlu1 %152 }
  0x76   :  { %v161_v13 = vmax.f32 %v145_v11, %v2540_v1  ;;  %v157_v14 = vsel %vm2600_vm7, %v2540_v1, %v153_v12 }
  0x78   :  { %v165_v15 = vmax.f32 %v161_v13, %v157_v14  ;;  %v139_v16 = vpop.permute.xlu0 %138 }
  0x79   :  { %v144_v17 = vsel %vm2596_vm6, %v2545_v2, %v139_v16  ;;  %v137_v18 = vpop.permute.xlu1 %136 }
  0x7a   :  { %v160_v19 = vmax.f32 %v144_v17, %v2545_v2  ;;  %2217 = vmatprep.subr.mxu1 %v165_v15  ;;  %v143_v20 = vsel %vm2596_vm6, %v2556_v3, %v137_v18  ;;  %v1959_v18 = vld [vmem:[%s3372_s1 + $0x110] sm:$0xff] }
  0x7b   :  { %2218 = vmatpush3.msra.mxu1 %v165_v15  ;;  %v159_v25 = vmax.f32 %v143_v20, %v2556_v3 }
  0x7c   :  { %v151_v21 = vpop.permute.xlu0 %150 }
  0x7d   :  { %v156_v22 = vsel %vm2600_vm7, %v2545_v2, %v151_v21  ;;  %v135_v23 = vpop.permute.xlu1 %134 }
  0x7e   :  { %v164_v24 = vmax.f32 %v160_v19, %v156_v22  ;;  %v142_v26 = vsel %vm2596_vm6, %v2566_v4, %v135_v23 }
  0x7f   :  { %v158_v27 = vmax.f32 %v142_v26, %v2566_v4 }
  0x80   :  { %v149_v28 = vpop.permute.xlu0 %148  ;;  %2219 = vmatprep.subr.mxu1 %v164_v24 }
  0x81   :  { %v155_v29 = vsel %vm2600_vm7, %v2556_v3, %v149_v28  ;;  %2220 = vmatpush3.msra.mxu1 %v164_v24  ;;  %v147_v30 = vpop.permute.xlu1 %146 }
  0x82   :  { %v163_v31 = vmax.f32 %v159_v25, %v155_v29  ;;  %v154_v32 = vsel %vm2600_vm7, %v2566_v4, %v147_v30 }
  0x83   :  { %v162_v33 = vmax.f32 %v158_v27, %v154_v32 }
  0x84   :  { %2221 = vmatprep.subr.mxu1 %v163_v31 }
  0x85   :  { %2222 = vmatpush3.msra.mxu1 %v163_v31 }
  0x86   :  { %2223 = vmatprep.subr.mxu1 %v162_v33 }
  0x87   :  { %2224 = vmatpush3.msra.mxu1 %v162_v33 }
  0xc9   :  { %v114_v34 = vpop.f32.mrf.mxu1 }
  0xca   :  { %130 = vrot.lane.b32.xlu1 %v114_v34, %s2499_s0  ;;  %132 = vrot.lane.b32.xlu0 %v114_v34, %s2500_s24 }
  0xcb   :  { %v2216_v35 = vpop.f32.mrf.mxu1 }
  0xce   :  { %126 = vrot.lane.b32.xlu1 %v114_v34, %s2498_s19  ;;  %128 = vrot.lane.b32.xlu0 %v114_v34, %s2501_s27 }
  0xd2   :  { %122 = vrot.lane.b32.xlu1 %v114_v34, %s2502_s28  ;;  %124 = vrot.lane.b32.xlu0 %v114_v34, %s2497_s16 }
  0xd6   :  { %118 = vrot.lane.b32.xlu1 %v114_v34, %s2504_s29  ;;  %120 = vrot.lane.b32.xlu0 %v114_v34, %s2505_s30 }
  0xda   :  { %178 = vperm.xlu1 %2471, %v2647_v38   ;;  %183 = vperm.xlu0 %2470, %v2652_v39  }
  0xde   :  { %173 = vperm.xlu1 %2471, %v2659_v40   ;;  %168 = vperm.xlu0 %2470, %v2664_v41  }
 0x13c   :  { %v131_v42 = vpop.permute.xlu1 %130  ;;  %v133_v43 = vpop.permute.xlu0 %132 }
 0x13d   :  { %2225 = vmatprep.subr.mxu1 %v133_v43 }
 0x13e   :  { %2226 = vmatpush3.msra.mxu1 %v133_v43 }
 0x13f   :  { %2227 = vmatprep.subr.mxu1 %v131_v42 }
 0x140   :  { %v127_v44 = vpop.permute.xlu1 %126  ;;  %2228 = vmatpush3.msra.mxu1 %v131_v42  ;;  %v129_v45 = vpop.permute.xlu0 %128 }
 0x141   :  { %2229 = vmatprep.subr.mxu1 %v129_v45 }
 0x142   :  { %2230 = vmatpush3.msra.mxu1 %v129_v45 }
 0x143   :  { %2231 = vmatprep.subr.mxu1 %v127_v44 }
 0x144   :  { %2232 = vmatpush3.msra.mxu1 %v127_v44  ;;  %v125_v46 = vpop.permute.xlu0 %124  ;;  %v123_v47 = vpop.permute.xlu1 %122 }
 0x145   :  { %2233 = vmatprep.subr.mxu1 %v114_v34 }
 0x146   :  { %2234 = vmatpush3.msra.mxu1 %v114_v34 }
 0x147   :  { %2235 = vmatprep.subr.mxu1 %v125_v46 }
 0x148   :  { %2236 = vmatpush3.msra.mxu1 %v125_v46  ;;  %v121_v48 = vpop.permute.xlu0 %120  ;;  %v119_v49 = vpop.permute.xlu1 %118 }
 0x149   :  { %2237 = vmatprep.subr.mxu1 %v123_v47 }
 0x14a   :  { %2238 = vmatpush3.msra.mxu1 %v123_v47 }
 0x14b   :  { %2239 = vmatprep.subr.mxu1 %v121_v48 }
 0x14c   :  { %2240 = vmatpush3.msra.mxu1 %v121_v48 }
 0x14d   :  { %2241 = vmatprep.subr.mxu1 %v119_v49 }
 0x14e   :  { %2242 = vmatpush3.msra.mxu1 %v119_v49 }
 0x14f   :  { %2244 = vmatmul.mubr.msk.f32.vlgmr.msra.gmra.mxu1 %vm186_vm8, %v38_v50  ;;  %2292 = vmatprep.subr.mxu1 %v2495_v0  ;;  %v1955_v50 = vld [vmem:[%s3372_s1 + $0x90] sm:$0xff] }
 0x150   :  { %2246 = vmatprep.mubr.msk.f32.mxu1 %vm186_vm8, %v39_v51  ;;  %v2506_v51 = vmov 1  }
 0x151   :  { %2472 = vset.pattern.permute.xlu1 %v2506_v51  ;;  %2473 = vset.pattern.permute.xlu0 %v2506_v51 }
 0x153   :  { %2247 = vmatmul.mubr.msk.f32.gmra.mxu1 %vm186_vm8, %v40_v52 }
 0x154   :  { %2300 = vmatprep.mubr.msk.f32.mxu1 %vm2496_vm0, %v2495_v0 }
 0x155   :  { %v179_v53 = vpop.permute.xlu1 %178  ;;  %v184_v54 = vpop.permute.xlu0 %183 }
 0x159   :  { %v174_v55 = vpop.permute.xlu1 %173  ;;  %v169_v61 = vpop.permute.xlu0 %168 }
 0x20f   :  { %v2245_v56 = vpop.f32.mrf.mxu1 }
 0x210   :  { %v271_v57 = vadd.f32 %v2245_v56, %v174_v55 }
 0x211   :  { %v265_v59 = vpop.f32.mrf.mxu1 }
 0x212   :  { %v285_v60 = vmax.f32 %v271_v57, 0.0  ;;  %v266_v11 = vadd.f32 %v265_v59, %v169_v61  ;;  %v1956_v61 = vld [vmem:[%s3372_s1 + $0xa0] sm:$0xff] }
 0x213   :  { %v2248_v62 = vpop.f32.mrf.mxu1 }
 0x214   :  { %v289_v63 = vsel %vm2687_vm15, %v285_v60, 0.0  ;;  %v281_v5 = vadd.f32 %v2248_v62, %v184_v54  ;;  %v284_v16 = vmax.f32 %v266_v11, 0.0  ;;  %v1957_v62 = vld [vmem:[%s3372_s1 + $0xb0] sm:$0xff] }
 0x215   :  { %389 = vrot.lane.b32.xlu0 %v289_v63, %s2497_s16  ;;  %v275_v10 = vpop.f32.mrf.mxu1 }
 0x216   :  { %v287_v12 = vmax.f32 %v281_v5, 0.0  ;;  %v276_v13 = vadd.f32 %v275_v10, %v179_v53  ;;  %v288_v19 = vsel %vm2687_vm15, %v284_v16, 0.0 }
 0x218   :  { %v291_v14 = vsel %vm2687_vm15, %v287_v12, 0.0  ;;  %v286_v15 = vmax.f32 %v276_v13, 0.0  ;;  %2250 = vmatpush3.msk.msra.mxu0 %vm2687_vm15, %v287_v12 }
 0x219   :  { %2251 = vmatprep.subr.mxu0 %v2495_v0  ;;  %393 = vrot.lane.b32.xlu1 %v291_v14, %s2497_s16 }
 0x21a   :  { %v290_v17 = vsel %vm2687_vm15, %v286_v15, 0.0  ;;  %2252 = vmatpush3.msk.msra.mxu0 %vm2687_vm15, %v286_v15 }
 0x21b   :  { %2253 = vmatprep.subr.mxu0 %v2495_v0  ;;  %391 = vrot.lane.b32.xlu0 %v290_v17, %s2497_s16 }
 0x21c   :  { %2254 = vmatpush3.msk.msra.mxu0 %vm2687_vm15, %v285_v60 }
 0x21d   :  { %405 = vrot.lane.b32.xlu1 %v291_v14, %s2498_s19  ;;  %2255 = vmatprep.subr.mxu0 %v2495_v0 }
 0x21e   :  { %2256 = vmatpush3.msk.msra.mxu0 %vm2687_vm15, %v284_v16 }
 0x21f   :  { %2258 = vmatmul.mubr.msk.f32.vlgmr.msra.gmra.mxu0 %vm44_vm1, %v1959_v18  ;;  %387 = vrot.lane.b32.xlu0 %v288_v19, %s2497_s16 }
 0x220   :  { %2286 = vmatprep.mubr.msk.f32.mxu0 %vm186_vm8, %v1955_v50 }
 0x221   :  { %403 = vrot.lane.b32.xlu1 %v290_v17, %s2498_s19 }
 0x223   :  { %399 = vrot.lane.b32.xlu0 %v288_v19, %s2498_s19 }
 0x225   :  { %401 = vrot.lane.b32.xlu1 %v289_v63, %s2498_s19 }
 0x287   :  { %v390_v20 = vpop.permute.xlu0 %389 }
 0x288   :  { %v396_v32 = vsel %vm2596_vm6, %v289_v63, %v390_v20 }
 0x289   :  { %v412_v37 = vmax.f32 %v396_v32, %v289_v63 }
 0x28b   :  { %v394_v21 = vpop.permute.xlu1 %393 }
 0x28c   :  { %v398_v22 = vsel %vm2596_vm6, %v291_v14, %v394_v21 }
 0x28d   :  { %v392_v23 = vpop.permute.xlu0 %391  ;;  %v414_v24 = vmax.f32 %v398_v22, %v291_v14 }
 0x28e   :  { %v397_v26 = vsel %vm2596_vm6, %v290_v17, %v392_v23 }
 0x28f   :  { %v406_v25 = vpop.permute.xlu1 %405  ;;  %v413_v30 = vmax.f32 %v397_v26, %v290_v17 }
 0x290   :  { %v410_v27 = vsel %vm2600_vm7, %v291_v14, %v406_v25 }
 0x291   :  { %v418_v28 = vmax.f32 %v414_v24, %v410_v27  ;;  %v388_v29 = vpop.permute.xlu0 %387 }
 0x292   :  { %v395_v36 = vsel %vm2596_vm6, %v288_v19, %v388_v29 }
 0x293   :  { %v404_v31 = vpop.permute.xlu1 %403  ;;  %2260 = vmatprep.subr.mxu0 %v418_v28  ;;  %v411_v45 = vmax.f32 %v395_v36, %v288_v19 }
 0x294   :  { %v409_v33 = vsel %vm2600_vm7, %v290_v17, %v404_v31  ;;  %2261 = vmatpush3.msra.mxu0 %v418_v28  ;;  %v1985_v28 = vld [vmem:[%s3372_s1 + $0x1a0] sm:$0xff] }
 0x295   :  { %v417_v34 = vmax.f32 %v413_v30, %v409_v33  ;;  %v400_v35 = vpop.permute.xlu0 %399 }
 0x296   :  { %v407_v43 = vsel %vm2600_vm7, %v288_v19, %v400_v35 }
 0x297   :  { %v402_v42 = vpop.permute.xlu1 %401  ;;  %2262 = vmatprep.subr.mxu0 %v417_v34  ;;  %v415_v47 = vmax.f32 %v411_v45, %v407_v43 }
 0x298   :  { %v408_v44 = vsel %vm2600_vm7, %v289_v63, %v402_v42  ;;  %2263 = vmatpush3.msra.mxu0 %v417_v34  ;;  %v1958_v63 = vld [vmem:[%s3372_s1 + $0xc0] sm:$0xff] }
 0x299   :  { %v416_v46 = vmax.f32 %v412_v37, %v408_v44 }
 0x29b   :  { %2264 = vmatprep.subr.mxu0 %v416_v46 }
 0x29c   :  { %2265 = vmatpush3.msra.mxu0 %v416_v46 }
 0x29d   :  { %2266 = vmatprep.subr.mxu0 %v415_v47 }
 0x29e   :  { %2267 = vmatpush3.msra.mxu0 %v415_v47 }
 0x2df   :  { %v367_v48 = vpop.f32.mrf.mxu0 }
 0x2e0   :  { %385 = vrot.lane.b32.xlu1 %v367_v48, %s2500_s24  ;;  %383 = vrot.lane.b32.xlu0 %v367_v48, %s2499_s0 }
 0x2e1   :  { %v2259_v49 = vpop.f32.mrf.mxu0 }
 0x2e4   :  { %381 = vrot.lane.b32.xlu1 %v367_v48, %s2501_s27  ;;  %379 = vrot.lane.b32.xlu0 %v367_v48, %s2498_s19 }
 0x2e8   :  { %377 = vrot.lane.b32.xlu1 %v367_v48, %s2497_s16  ;;  %375 = vrot.lane.b32.xlu0 %v367_v48, %s2502_s28 }
 0x2ec   :  { %373 = vrot.lane.b32.xlu1 %v367_v48, %s2505_s30  ;;  %371 = vrot.lane.b32.xlu0 %v367_v48, %s2504_s29 }
 0x2f0   :  { %432 = vperm.xlu1 %2472, %v2652_v39   ;;  %428 = vperm.xlu0 %2473, %v2647_v38  }
 0x2f4   :  { %424 = vperm.xlu1 %2472, %v2659_v40  }
 0x2f8   :  { %420 = vperm.xlu1 %2472, %v2664_v41  }
 0x352   :  { %v386_v52 = vpop.permute.xlu1 %385  ;;  %v384_v53 = vpop.permute.xlu0 %383 }
 0x353   :  { %2268 = vmatprep.subr.mxu0 %v386_v52 }
 0x354   :  { %2269 = vmatpush3.msra.mxu0 %v386_v52 }
 0x355   :  { %2270 = vmatprep.subr.mxu0 %v384_v53 }
 0x356   :  { %v382_v54 = vpop.permute.xlu1 %381  ;;  %2271 = vmatpush3.msra.mxu0 %v384_v53  ;;  %v380_v55 = vpop.permute.xlu0 %379 }
 0x357   :  { %2272 = vmatprep.subr.mxu0 %v382_v54 }
 0x358   :  { %2273 = vmatpush3.msra.mxu0 %v382_v54 }
 0x359   :  { %2274 = vmatprep.subr.mxu0 %v380_v55 }
 0x35a   :  { %v378_v56 = vpop.permute.xlu1 %377  ;;  %2275 = vmatpush3.msra.mxu0 %v380_v55  ;;  %v376_v57 = vpop.permute.xlu0 %375 }
 0x35b   :  { %2276 = vmatprep.subr.mxu0 %v367_v48 }
 0x35c   :  { %2277 = vmatpush3.msra.mxu0 %v367_v48 }
 0x35d   :  { %2278 = vmatprep.subr.mxu0 %v378_v56 }
 0x35e   :  { %2279 = vmatpush3.msra.mxu0 %v378_v56  ;;  %v374_v59 = vpop.permute.xlu1 %373  ;;  %v372_v60 = vpop.permute.xlu0 %371 }
 0x35f   :  { %2280 = vmatprep.subr.mxu0 %v376_v57 }
 0x360   :  { %2281 = vmatpush3.msra.mxu0 %v376_v57  ;;  %v1970_v57 = vld [vmem:[%s3372_s1 + $0x128] sm:$0xff] }
 0x361   :  { %2282 = vmatprep.subr.mxu0 %v374_v59 }
 0x362   :  { %2283 = vmatpush3.msra.mxu0 %v374_v59  ;;  %v2507_v59 = vmov 2  }
 0x363   :  { %2284 = vmatprep.subr.mxu0 %v372_v60  ;;  %2474 = vset.pattern.permute.xlu0 %v2507_v59 }
 0x364   :  { %2285 = vmatpush3.msra.mxu0 %v372_v60  ;;  %2475 = vset.pattern.permute.xlu1 %v2507_v59  ;;  %v2508_v60 = vmov 6  }
 0x365   :  { %2287 = vmatmul.mubr.msk.f32.vlgmr.msra.gmra.mxu0 %vm186_vm8, %v1956_v61  ;;  %2303 = vmatprep.subr.mxu0 %v2495_v0 }
 0x366   :  { %2289 = vmatprep.mubr.msk.f32.mxu0 %vm186_vm8, %v1957_v62 }
 0x369   :  { %2290 = vmatmul.mubr.msk.f32.gmra.mxu0 %vm186_vm8, %v1958_v63 }
 0x36a   :  { %2311 = vmatprep.mubr.msk.f32.mxu0 %vm2496_vm0, %v2495_v0 }
 0x36b   :  { %v433_v5 = vpop.permute.xlu1 %432  ;;  %v429_v17 = vpop.permute.xlu0 %428 }
 0x36f   :  { %v425_v10 = vpop.permute.xlu1 %424 }
 0x373   :  { %v421_v15 = vpop.permute.xlu1 %420 }
 0x425   :  { %v2288_v11 = vpop.f32.mrf.mxu0 }
 0x426   :  { %v519_v12 = vadd.f32 %v2288_v11, %v425_v10 }
 0x427   :  { %v513_v13 = vpop.f32.mrf.mxu0 }
 0x428   :  { %v533_v14 = vmax.f32 %v519_v12, 0.0  ;;  %v514_v21 = vadd.f32 %v513_v13, %v421_v15  ;;  %v1972_v15 = vld [vmem:[%s3372_s1 + $0x138] sm:$0xff] }
 0x429   :  { %v2291_v16 = vpop.f32.mrf.mxu0 }
 0x42a   :  { %v537_v18 = vsel %vm2687_vm15, %v533_v14, 0.0  ;;  %v529_v19 = vadd.f32 %v2291_v16, %v433_v5  ;;  %v532_v26 = vmax.f32 %v514_v21, 0.0  ;;  %v1971_v16 = vld [vmem:[%s3372_s1 + $0x130] sm:$0xff]  ;;  %v1977_v21 = vld [vmem:[%s3372_s1 + $0x160] sm:$0xff] }
 0x42b   :  { %649 = vrot.lane.b32.xlu1 %v537_v18, %s2497_s16  ;;  %v523_v20 = vpop.f32.mrf.mxu0 }
 0x42c   :  { %v535_v22 = vmax.f32 %v529_v19, 0.0  ;;  %v524_v23 = vadd.f32 %v523_v20, %v429_v17  ;;  %v536_v29 = vsel %vm2687_vm15, %v532_v26, 0.0  ;;  %v1974_v17 = vld [vmem:[%s3372_s1 + $0x148] sm:$0xff]  ;;  %v1975_v19 = vld [vmem:[%s3372_s1 + $0x150] sm:$0xff] }
 0x42d   :  { %v1978_v20 = vld [vmem:[%s3372_s1 + $0x168] sm:$0xff] }
 0x42e   :  { %v539_v24 = vsel %vm2687_vm15, %v535_v22, 0.0  ;;  %v534_v25 = vmax.f32 %v524_v23, 0.0  ;;  %2293 = vmatpush3.msk.msra.mxu1 %vm2687_vm15, %v535_v22  ;;  %v1980_v22 = vld [vmem:[%s3372_s1 + $0x178] sm:$0xff]  ;;  %v1979_v23 = vld [vmem:[%s3372_s1 + $0x170] sm:$0xff] }
 0x42f   :  { %2294 = vmatprep.subr.mxu1 %v2495_v0  ;;  %653 = vrot.lane.b32.xlu0 %v539_v24, %s2497_s16 }
 0x430   :  { %v538_v27 = vsel %vm2687_vm15, %v534_v25, 0.0  ;;  %2295 = vmatpush3.msk.msra.mxu1 %vm2687_vm15, %v534_v25  ;;  %v1981_v25 = vld [vmem:[%s3372_s1 + $0x180] sm:$0xff] }
 0x431   :  { %2296 = vmatprep.subr.mxu1 %v2495_v0  ;;  %651 = vrot.lane.b32.xlu1 %v538_v27, %s2497_s16 }
 0x432   :  { %2297 = vmatpush3.msk.msra.mxu1 %vm2687_vm15, %v533_v14  ;;  %v1969_v14 = vld [vmem:[%s3372_s1 + $0x120] sm:$0xff] }
 0x433   :  { %665 = vrot.lane.b32.xlu0 %v539_v24, %s2498_s19  ;;  %2298 = vmatprep.subr.mxu1 %v2495_v0 }
 0x434   :  { %2299 = vmatpush3.msk.msra.mxu1 %vm2687_vm15, %v532_v26  ;;  %v1984_v26 = vld [vmem:[%s3372_s1 + $0x198] sm:$0xff] }
 0x435   :  { %2301 = vmatmul.mubr.msk.f32.vlgmr.msra.gmra.mxu1 %vm44_vm1, %v1985_v28  ;;  %647 = vrot.lane.b32.xlu1 %v536_v29, %s2497_s16 }
 0x436   :  { %704 = vmatprep.subr.mxu1 %v2495_v0  ;;  %1991 = vmatprep.mubr.msk.f32.mxu1 %vm679_vm2, %v1970_v57 }
 0x437   :  { %663 = vrot.lane.b32.xlu0 %v538_v27, %s2498_s19  ;;  %705 = vmatpush1.msra.mxu1 %v2545_v2 }
 0x438   :  { %706 = vmatprep.subr.mxu1 %v2495_v0 }
 0x439   :  { %659 = vrot.lane.b32.xlu1 %v536_v29, %s2498_s19  ;;  %707 = vmatpush1.msra.mxu1 %v2556_v3 }
 0x43a   :  { %708 = vmatprep.subr.mxu1 %v2495_v0 }
 0x43b   :  { %661 = vrot.lane.b32.xlu0 %v537_v18, %s2498_s19  ;;  %709 = vmatpush1.msra.mxu1 %v2566_v4 }
 0x43c   :  { %710 = vmatprep.subr.mxu1 %v2495_v0 }
 0x49d   :  { %v650_v30 = vpop.permute.xlu1 %649 }
 0x49e   :  { %v656_v43 = vsel %vm2596_vm6, %v537_v18, %v650_v30 }
 0x49f   :  { %v672_v48 = vmax.f32 %v656_v43, %v537_v18 }
 0x4a1   :  { %v654_v31 = vpop.permute.xlu0 %653 }
 0x4a2   :  { %v658_v32 = vsel %vm2596_vm6, %v539_v24, %v654_v31 }
 0x4a3   :  { %v652_v2 = vpop.permute.xlu1 %651  ;;  %v674_v33 = vmax.f32 %v658_v32, %v539_v24 }
 0x4a4   :  { %v657_v35 = vsel %vm2596_vm6, %v538_v27, %v652_v2 }
 0x4a5   :  { %v666_v34 = vpop.permute.xlu0 %665  ;;  %v673_v42 = vmax.f32 %v657_v35, %v538_v27 }
 0x4a6   :  { %v670_v3 = vsel %vm2600_vm7, %v539_v24, %v666_v34  ;;  %v1982_v24 = vld [vmem:[%s3372_s1 + $0x188] sm:$0xff] }
 0x4a7   :  { %v678_v36 = vmax.f32 %v674_v33, %v670_v3  ;;  %v648_v37 = vpop.permute.xlu1 %647 }
 0x4a8   :  { %v655_v47 = vsel %vm2596_vm6, %v536_v29, %v648_v37 }
 0x4a9   :  { %711 = vmatpush1.msra.mxu1 %v678_v36  ;;  %v664_v4 = vpop.permute.xlu0 %663  ;;  %v671_v52 = vmax.f32 %v655_v47, %v536_v29 }
 0x4aa   :  { %v669_v44 = vsel %vm2600_vm7, %v538_v27, %v664_v4  ;;  %712 = vmatprep.subr.mxu1 %v2495_v0  ;;  %v1983_v27 = vld [vmem:[%s3372_s1 + $0x190] sm:$0xff] }
 0x4ab   :  { %v677_v45 = vmax.f32 %v673_v42, %v669_v44  ;;  %v660_v46 = vpop.permute.xlu1 %659 }
 0x4ac   :  { %v667_v50 = vsel %vm2600_vm7, %v536_v29, %v660_v46 }
 0x4ad   :  { %713 = vmatpush1.msra.mxu1 %v677_v45  ;;  %v662_v49 = vpop.permute.xlu0 %661  ;;  %v675_v54 = vmax.f32 %v671_v52, %v667_v50 }
 0x4ae   :  { %v668_v51 = vsel %vm2600_vm7, %v537_v18, %v662_v49  ;;  %714 = vmatprep.subr.mxu1 %v2495_v0  ;;  %v1973_v18 = vld [vmem:[%s3372_s1 + $0x140] sm:$0xff] }
 0x4af   :  { %v676_v53 = vmax.f32 %v672_v48, %v668_v51 }
 0x4b1   :  { %715 = vmatpush1.msra.mxu1 %v676_v53 }
 0x4b2   :  { %716 = vmatprep.subr.mxu1 %v2495_v0 }
 0x4b3   :  { %717 = vmatpush1.msra.mxu1 %v675_v54 }
 0x4b4   :  { %718 = vmatprep.subr.mxu1 %v2495_v0 }
 0x4f5   :  { %v627_v55 = vpop.f32.mrf.mxu1 }
 0x4f6   :  { %645 = vrot.lane.b32.xlu0 %v627_v55, %s2500_s24  ;;  %643 = vrot.lane.b32.xlu1 %v627_v55, %s2499_s0 }
 0x4f7   :  { %v2302_v56 = vpop.f32.mrf.mxu1 }
 0x4fa   :  { %641 = vrot.lane.b32.xlu0 %v627_v55, %s2501_s27  ;;  %639 = vrot.lane.b32.xlu1 %v627_v55, %s2498_s19 }
 0x4fe   :  { %637 = vrot.lane.b32.xlu0 %v627_v55, %s2497_s16  ;;  %635 = vrot.lane.b32.xlu1 %v627_v55, %s2502_s28 }
 0x502   :  { %633 = vrot.lane.b32.xlu0 %v627_v55, %s2505_s30  ;;  %631 = vrot.lane.b32.xlu1 %v627_v55, %s2504_s29 }
 0x506   :  { %822 = vperm.xlu0 %2474, %v2652_v39   ;;  %818 = vperm.xlu1 %2475, %v2647_v38  }
 0x50a   :  { %810 = vperm.xlu0 %2474, %v2664_v41   ;;  %814 = vperm.xlu1 %2475, %v2659_v40  }
 0x50e   :  { %2476 = vset.pattern.permute.xlu1 %v2508_v60  ;;  %2477 = vset.pattern.permute.xlu0 %v2508_v60 }
 0x50f   :  { %850 = vperm.xlu1 %2476, %v2652_v39   ;;  %846 = vperm.xlu0 %2477, %v2647_v38  }
 0x513   :  { %842 = vperm.xlu1 %2476, %v2659_v40  }
 0x517   :  { %838 = vperm.xlu1 %2476, %v2664_v41  }
 0x568   :  { %v644_v61 = vpop.permute.xlu1 %643  ;;  %v646_v62 = vpop.permute.xlu0 %645 }
 0x569   :  { %719 = vmatpush1.msra.mxu1 %v646_v62 }
 0x56a   :  { %720 = vmatprep.subr.mxu1 %v2495_v0 }
 0x56b   :  { %721 = vmatpush1.msra.mxu1 %v644_v61 }
 0x56c   :  { %v640_v63 = vpop.permute.xlu1 %639  ;;  %722 = vmatprep.subr.mxu1 %v2495_v0  ;;  %v642_v5 = vpop.permute.xlu0 %641 }
 0x56d   :  { %723 = vmatpush1.msra.mxu1 %v642_v5 }
 0x56e   :  { %724 = vmatprep.subr.mxu1 %v2495_v0 }
 0x56f   :  { %725 = vmatpush1.msra.mxu1 %v640_v63 }
 0x570   :  { %726 = vmatprep.subr.mxu1 %v2495_v0  ;;  %v638_v10 = vpop.permute.xlu0 %637  ;;  %v636_v11 = vpop.permute.xlu1 %635 }
 0x571   :  { %727 = vmatpush1.msra.mxu1 %v627_v55 }
 0x572   :  { %728 = vmatprep.subr.mxu1 %v2495_v0 }
 0x573   :  { %729 = vmatpush1.msra.mxu1 %v638_v10 }
 0x574   :  { %730 = vmatprep.subr.mxu1 %v2495_v0  ;;  %v634_v12 = vpop.permute.xlu0 %633  ;;  %v632_v13 = vpop.permute.xlu1 %631 }
 0x575   :  { %731 = vmatpush1.msra.mxu1 %v636_v11 }
 0x576   :  { %732 = vmatprep.subr.mxu1 %v2495_v0 }
 0x577   :  { %733 = vmatpush1.msra.mxu1 %v634_v12 }
 0x578   :  { %734 = vmatprep.subr.mxu1 %v2495_v0 }
 0x579   :  { %735 = vmatpush1.msra.mxu1 %v632_v13 }
 0x57a   :  { %766 = vmatprep.subr.mxu1 %v2495_v0 }
 0x57b   :  { %767 = vmatpush2.msra.mxu1 %v2540_v1  ;;  %v1976_v1 = vld [vmem:[%s3372_s1 + $0x158] sm:$0xff] }
 0x57c   :  { %769 = vmatmul.mubr.f32.vlgmr.msra.gmra.mxu1 %v1969_v14 }
 0x57d   :  { %1992 = vmatprep.mubr.msk.f32.mxu1 %vm679_vm2, %v1972_v15 }
 0x580   :  { %774 = vmatmul.mubr.f32.gmra.mxu1 %v1971_v16 }
 0x581   :  { %1993 = vmatprep.mubr.msk.f32.mxu1 %vm679_vm2, %v1974_v17  ;;  %v819_v30 = vpop.permute.xlu1 %818  ;;  %v823_v33 = vpop.permute.xlu0 %822 }
 0x584   :  { %779 = vmatmul.mubr.f32.gmra.mxu1 %v1973_v18 }
 0x585   :  { %1994 = vmatprep.mubr.msk.f32.mxu1 %vm679_vm2, %v1976_v1  ;;  %v815_v34 = vpop.permute.xlu1 %814  ;;  %v811_v42 = vpop.permute.xlu0 %810 }
 0x588   :  { %784 = vmatmul.mubr.f32.gmra.mxu1 %v1975_v19 }
 0x589   :  { %1995 = vmatprep.mubr.msk.f32.mxu1 %vm679_vm2, %v1978_v20 }
 0x58a   :  { %v851_v36 = vpop.permute.xlu1 %850  ;;  %v847_v59 = vpop.permute.xlu0 %846 }
 0x58c   :  { %789 = vmatmul.mubr.f32.gmra.mxu1 %v1977_v21 }
 0x58d   :  { %1996 = vmatprep.mubr.msk.f32.mxu1 %vm679_vm2, %v1980_v22  ;;  %v2003_v22 = vld [vmem:[%s3372_s1 + $0x230] sm:$0xff] }
 0x58e   :  { %v843_v48 = vpop.permute.xlu1 %842 }
 0x590   :  { %794 = vmatmul.mubr.f32.gmra.mxu1 %v1979_v23 }
 0x591   :  { %1997 = vmatprep.mubr.msk.f32.mxu1 %vm679_vm2, %v1982_v24 }
 0x592   :  { %v839_v60 = vpop.permute.xlu1 %838 }
 0x594   :  { %799 = vmatmul.mubr.f32.gmra.mxu1 %v1981_v25 }
 0x595   :  { %1998 = vmatprep.mubr.msk.f32.mxu1 %vm679_vm2, %v1984_v26 }
 0x598   :  { %804 = vmatmul.mubr.f32.gmra.mxu1 %v1983_v27 }
 0x63c   :  { %v770_v28 = vpop.f32.mrf.mxu1 }
 0x63d   :  { %v825_v44 = vadd.f32 %v811_v42, %v770_v28 }
 0x63e   :  { %v772_v29 = vpop.f32.mrf.mxu1 }
 0x63f   :  { %v829_v51 = vmax.f32 %v825_v44, 0.0 }
 0x640   :  { %v775_v31 = vpop.f32.mrf.mxu1 }
 0x641   :  { %v826_v4 = vadd.f32 %v815_v34, %v775_v31 }
 0x642   :  { %v777_v32 = vpop.f32.mrf.mxu1 }
 0x643   :  { %v830_v46 = vmax.f32 %v826_v4, 0.0 }
 0x644   :  { %v780_v2 = vpop.f32.mrf.mxu1 }
 0x645   :  { %v827_v47 = vadd.f32 %v819_v30, %v780_v2 }
 0x646   :  { %v782_v35 = vpop.f32.mrf.mxu1 }
 0x647   :  { %v831_v53 = vmax.f32 %v827_v47, 0.0 }
 0x648   :  { %v785_v3 = vpop.f32.mrf.mxu1 }
 0x649   :  { %v828_v54 = vadd.f32 %v823_v33, %v785_v3 }
 0x64a   :  { %v787_v37 = vpop.f32.mrf.mxu1 }
 0x64b   :  { %v832_v5 = vmax.f32 %v828_v54, 0.0 }
 0x64c   :  { %v790_v43 = vpop.f32.mrf.mxu1 }
 0x64d   :  { %v833_v56 = vadd.f32 %v829_v51, %v790_v43  ;;  %v2509_v51 = vmov 3  }
 0x64e   :  { %v792_v45 = vpop.f32.mrf.mxu1  ;;  %2479 = vset.pattern.permute.xlu1 %v2509_v51  ;;  %2478 = vset.pattern.permute.xlu0 %v2509_v51 }
 0x64f   :  { %v853_v12 = vadd.f32 %v839_v60, %v833_v56 }
 0x650   :  { %v795_v49 = vpop.f32.mrf.mxu1 }
 0x651   :  { %v834_v50 = vadd.f32 %v830_v46, %v795_v49  ;;  %v2920_v1 = vmax.f32 %v853_v12, 0.0 }
 0x652   :  { %v797_v52 = vpop.f32.mrf.mxu1 }
 0x653   :  { %v854_v55 = vadd.f32 %v843_v48, %v834_v50  ;;  %v861_v21 = vsel %vm2687_vm15, %v2920_v1, 0.0  ;;  %v1999_v50 = vld [vmem:[%s3372_s1 + $0x1b0] sm:$0xff] }
 0x654   :  { %v800_v57 = vpop.f32.mrf.mxu1 }
 0x655   :  { %v2909_v61 = vmax.f32 %v854_v55, 0.0  ;;  %v835_v62 = vadd.f32 %v831_v53, %v800_v57  ;;  %v2001_v57 = vld [vmem:[%s3372_s1 + $0x1d0] sm:$0xff] }
 0x656   :  { %v802_v63 = vpop.f32.mrf.mxu1 }
 0x657   :  { %v855_v10 = vadd.f32 %v847_v59, %v835_v62  ;;  %v862_v11 = vsel %vm2687_vm15, %v2909_v61, 0.0  ;;  %v2002_v59 = vld [vmem:[%s3372_s1 + $0x1e0] sm:$0xff] }
 0x658   :  { %962 = vrot.lane.b32.xlu1 %v862_v11, %s2497_s16  ;;  %v805_v13 = vpop.f32.mrf.mxu1 }
 0x659   :  { %v2915_v14 = vmax.f32 %v855_v10, 0.0  ;;  %v836_v15 = vadd.f32 %v832_v5, %v805_v13 }
 0x65a   :  { %v807_v16 = vpop.f32.mrf.mxu1 }
 0x65b   :  { %v863_v17 = vsel %vm2687_vm15, %v2915_v14, 0.0  ;;  %v856_v18 = vadd.f32 %v851_v36, %v836_v15 }
 0x65c   :  { %976 = vrot.lane.b32.xlu0 %v863_v17, %s2498_s19  ;;  %964 = vrot.lane.b32.xlu1 %v863_v17, %s2497_s16 }
 0x65d   :  { %v2924_v19 = vmax.f32 %v856_v18, 0.0 }
 0x65f   :  { %2304 = vmatpush3.msk.msra.mxu0 %vm2687_vm15, %v2924_v19  ;;  %v864_v20 = vsel %vm2687_vm15, %v2924_v19, 0.0 }
 0x660   :  { %2305 = vmatprep.subr.mxu0 %v2495_v0  ;;  %966 = vrot.lane.b32.xlu0 %v864_v20, %s2497_s16 }
 0x661   :  { %960 = vrot.lane.b32.xlu1 %v861_v21, %s2497_s16  ;;  %2306 = vmatpush3.msk.msra.mxu0 %vm2687_vm15, %v2915_v14 }
 0x662   :  { %2307 = vmatprep.subr.mxu0 %v2495_v0 }
 0x663   :  { %2308 = vmatpush3.msk.msra.mxu0 %vm2687_vm15, %v2909_v61 }
 0x664   :  { %2309 = vmatprep.subr.mxu0 %v2495_v0  ;;  %978 = vrot.lane.b32.xlu0 %v864_v20, %s2498_s19 }
 0x665   :  { %972 = vrot.lane.b32.xlu1 %v861_v21, %s2498_s19  ;;  %2310 = vmatpush3.msk.msra.mxu0 %vm2687_vm15, %v2920_v1 }
 0x666   :  { %2312 = vmatmul.mubr.msk.f32.vlgmr.msra.gmra.mxu0 %vm44_vm1, %v2003_v22 }
 0x667   :  { %2340 = vmatprep.mubr.msk.f32.mxu0 %vm186_vm8, %v1999_v50 }
 0x668   :  { %974 = vrot.lane.b32.xlu0 %v862_v11, %s2498_s19 }
 0x6ca   :  { %v963_v23 = vpop.permute.xlu1 %962 }
 0x6cb   :  { %v969_v2 = vsel %vm2596_vm6, %v862_v11, %v963_v23 }
 0x6cc   :  { %v985_v37 = vmax.f32 %v969_v2, %v862_v11 }
 0x6ce   :  { %v977_v24 = vpop.permute.xlu0 %976  ;;  %v965_v25 = vpop.permute.xlu1 %964 }
 0x6cf   :  { %v970_v27 = vsel %vm2596_vm6, %v863_v17, %v965_v25  ;;  %v982_v3 = vsel %vm2600_vm7, %v863_v17, %v977_v24 }
 0x6d0   :  { %v986_v30 = vmax.f32 %v970_v27, %v863_v17  ;;  %v2017_v27 = vld [vmem:[%s3372_s1 + $0x2c0] sm:$0xff] }
 0x6d2   :  { %v967_v26 = vpop.permute.xlu0 %966  ;;  %v990_v4 = vmax.f32 %v986_v30, %v982_v3 }
 0x6d3   :  { %v971_v28 = vsel %vm2596_vm6, %v864_v20, %v967_v26  ;;  %v961_v29 = vpop.permute.xlu1 %960 }
 0x6d4   :  { %v987_v31 = vmax.f32 %v971_v28, %v864_v20  ;;  %v968_v36 = vsel %vm2596_vm6, %v861_v21, %v961_v29 }
 0x6d5   :  { %v984_v45 = vmax.f32 %v968_v36, %v861_v21 }
 0x6d6   :  { %v979_v32 = vpop.permute.xlu0 %978 }
 0x6d7   :  { %v983_v33 = vsel %vm2600_vm7, %v864_v20, %v979_v32  ;;  %v973_v35 = vpop.permute.xlu1 %972 }
 0x6d8   :  { %v991_v34 = vmax.f32 %v987_v31, %v983_v33  ;;  %v980_v43 = vsel %vm2600_vm7, %v861_v21, %v973_v35 }
 0x6d9   :  { %v988_v47 = vmax.f32 %v984_v45, %v980_v43 }
 0x6da   :  { %2314 = vmatprep.subr.mxu0 %v991_v34  ;;  %v975_v42 = vpop.permute.xlu0 %974 }
 0x6db   :  { %v981_v44 = vsel %vm2600_vm7, %v862_v11, %v975_v42  ;;  %2315 = vmatpush3.msra.mxu0 %v991_v34 }
 0x6dc   :  { %v989_v46 = vmax.f32 %v985_v37, %v981_v44  ;;  %2316 = vmatprep.subr.mxu0 %v990_v4 }
 0x6dd   :  { %2317 = vmatpush3.msra.mxu0 %v990_v4 }
 0x6de   :  { %2318 = vmatprep.subr.mxu0 %v989_v46 }
 0x6df   :  { %2319 = vmatpush3.msra.mxu0 %v989_v46 }
 0x6e0   :  { %2320 = vmatprep.subr.mxu0 %v988_v47 }
 0x6e1   :  { %2321 = vmatpush3.msra.mxu0 %v988_v47 }
 0x726   :  { %v940_v48 = vpop.f32.mrf.mxu0 }
 0x727   :  { %958 = vrot.lane.b32.xlu0 %v940_v48, %s2500_s24  ;;  %956 = vrot.lane.b32.xlu1 %v940_v48, %s2499_s0 }
 0x728   :  { %v2313_v49 = vpop.f32.mrf.mxu0 }
 0x72b   :  { %954 = vrot.lane.b32.xlu0 %v940_v48, %s2501_s27  ;;  %952 = vrot.lane.b32.xlu1 %v940_v48, %s2498_s19 }
 0x72f   :  { %950 = vrot.lane.b32.xlu0 %v940_v48, %s2497_s16  ;;  %948 = vrot.lane.b32.xlu1 %v940_v48, %s2502_s28 }
 0x733   :  { %946 = vrot.lane.b32.xlu0 %v940_v48, %s2505_s30  ;;  %944 = vrot.lane.b32.xlu1 %v940_v48, %s2504_s29 }
 0x737   :  { %1001 = vperm.xlu1 %2479, %v2647_v38   ;;  %1005 = vperm.xlu0 %2478, %v2652_v39  }
 0x73b   :  { %997 = vperm.xlu1 %2479, %v2659_v40   ;;  %993 = vperm.xlu0 %2478, %v2664_v41   ;;  %v2000_v41 = vld [vmem:[%s3372_s1 + $0x1c0] sm:$0xff] }
 0x799   :  { %v959_v52 = vpop.permute.xlu0 %958  ;;  %v957_v53 = vpop.permute.xlu1 %956 }
 0x79a   :  { %2322 = vmatprep.subr.mxu0 %v959_v52 }
 0x79b   :  { %2323 = vmatpush3.msra.mxu0 %v959_v52 }
 0x79c   :  { %2324 = vmatprep.subr.mxu0 %v957_v53 }
 0x79d   :  { %v955_v54 = vpop.permute.xlu0 %954  ;;  %2325 = vmatpush3.msra.mxu0 %v957_v53  ;;  %v953_v55 = vpop.permute.xlu1 %952 }
 0x79e   :  { %2326 = vmatprep.subr.mxu0 %v955_v54 }
 0x79f   :  { %2327 = vmatpush3.msra.mxu0 %v955_v54 }
 0x7a0   :  { %2328 = vmatprep.subr.mxu0 %v953_v55 }
 0x7a1   :  { %v951_v56 = vpop.permute.xlu0 %950  ;;  %2329 = vmatpush3.msra.mxu0 %v953_v55  ;;  %v949_v38 = vpop.permute.xlu1 %948 }
 0x7a2   :  { %2330 = vmatprep.subr.mxu0 %v940_v48 }
 0x7a3   :  { %2331 = vmatpush3.msra.mxu0 %v940_v48 }
 0x7a4   :  { %2332 = vmatprep.subr.mxu0 %v951_v56 }
 0x7a5   :  { %2333 = vmatpush3.msra.mxu0 %v951_v56  ;;  %v947_v39 = vpop.permute.xlu0 %946  ;;  %v945_v40 = vpop.permute.xlu1 %944  ;;  %v2013_v56 = vld [vmem:[%s3372_s1 + $0x240] sm:$0xff] }
 0x7a6   :  { %2334 = vmatprep.subr.mxu0 %v949_v38  ;;  %2383 = vmatprep.mubr.msk.f32.mxu1 %vm186_vm8, %v2013_v56 }
 0x7a7   :  { %2335 = vmatpush3.msra.mxu0 %v949_v38  ;;  %v2510_v38 = vmov 4  }
 0x7a8   :  { %2336 = vmatprep.subr.mxu0 %v947_v39  ;;  %2480 = vset.pattern.permute.xlu1 %v2510_v38 }
 0x7a9   :  { %2337 = vmatpush3.msra.mxu0 %v947_v39  ;;  %2481 = vset.pattern.permute.xlu0 %v2510_v38  ;;  %v3068_v39 = vld [vmem:[%s3373_s2 + $0x18] sm:$0xff] }
 0x7aa   :  { %2338 = vmatprep.subr.mxu0 %v945_v40 }
 0x7ab   :  { %2339 = vmatpush3.msra.mxu0 %v945_v40  ;;  %v3074_v40 = vld [vmem:[%s3373_s2 + $0x10] sm:$0xff] }
 0x7ac   :  { %2341 = vmatmul.mubr.msk.f32.vlgmr.msra.gmra.mxu0 %vm186_vm8, %v2000_v41  ;;  %2346 = vmatprep.subr.mxu0 %v2495_v0  ;;  %v3080_v41 = vld [vmem:[%s3373_s2 + $0x8] sm:$0xff] }
 0x7ad   :  { %2343 = vmatprep.mubr.msk.f32.mxu0 %vm186_vm8, %v2001_v57  ;;  %v3086_v57 = vld [vmem:[%s3373_s2] sm:$0xff] }
 0x7b0   :  { %2344 = vmatmul.mubr.msk.f32.gmra.mxu0 %vm186_vm8, %v2002_v59 }
 0x7b1   :  { %2354 = vmatprep.mubr.msk.f32.mxu0 %vm2496_vm0, %v2495_v0 }
 0x7b2   :  { %v1002_v60 = vpop.permute.xlu1 %1001  ;;  %v1006_v62 = vpop.permute.xlu0 %1005 }
 0x7b6   :  { %v998_v63 = vpop.permute.xlu1 %997  ;;  %v994_v13 = vpop.permute.xlu0 %993 }
 0x86c   :  { %v2342_v5 = vpop.f32.mrf.mxu0 }
 0x86d   :  { %v1092_v10 = vadd.f32 %v2342_v5, %v998_v63 }
 0x86e   :  { %v1086_v11 = vpop.f32.mrf.mxu0 }
 0x86f   :  { %v1106_v12 = vmax.f32 %v1092_v10, 0.0  ;;  %v1087_v20 = vadd.f32 %v1086_v11, %v994_v13  ;;  %v2014_v13 = vld [vmem:[%s3372_s1 + $0x250] sm:$0xff] }
 0x870   :  { %v2345_v15 = vpop.f32.mrf.mxu0 }
 0x871   :  { %v1110_v16 = vsel %vm2687_vm15, %v1106_v12, 0.0  ;;  %v1102_v17 = vadd.f32 %v2345_v15, %v1006_v62  ;;  %v1105_v25 = vmax.f32 %v1087_v20, 0.0  ;;  %v2015_v15 = vld [vmem:[%s3372_s1 + $0x260] sm:$0xff] }
 0x872   :  { %v1096_v18 = vpop.f32.mrf.mxu0  ;;  %1210 = vrot.lane.b32.xlu0 %v1110_v16, %s2497_s16 }
 0x873   :  { %v1108_v21 = vmax.f32 %v1102_v17, 0.0  ;;  %v1097_v22 = vadd.f32 %v1096_v18, %v1002_v60  ;;  %v1109_v28 = vsel %vm2687_vm15, %v1105_v25, 0.0 }
 0x875   :  { %v1112_v23 = vsel %vm2687_vm15, %v1108_v21, 0.0  ;;  %v1107_v24 = vmax.f32 %v1097_v22, 0.0  ;;  %2347 = vmatpush3.msk.msra.mxu0 %vm2687_vm15, %v1108_v21 }
 0x876   :  { %2348 = vmatprep.subr.mxu0 %v2495_v0  ;;  %1214 = vrot.lane.b32.xlu1 %v1112_v23, %s2497_s16 }
 0x877   :  { %v1111_v26 = vsel %vm2687_vm15, %v1107_v24, 0.0  ;;  %2349 = vmatpush3.msk.msra.mxu0 %vm2687_vm15, %v1107_v24 }
 0x878   :  { %2350 = vmatprep.subr.mxu0 %v2495_v0  ;;  %1212 = vrot.lane.b32.xlu0 %v1111_v26, %s2497_s16 }
 0x879   :  { %2351 = vmatpush3.msk.msra.mxu0 %vm2687_vm15, %v1106_v12 }
 0x87a   :  { %1226 = vrot.lane.b32.xlu1 %v1112_v23, %s2498_s19  ;;  %2352 = vmatprep.subr.mxu0 %v2495_v0 }
 0x87b   :  { %2353 = vmatpush3.msk.msra.mxu0 %vm2687_vm15, %v1105_v25 }
 0x87c   :  { %2355 = vmatmul.mubr.msk.f32.vlgmr.msra.gmra.mxu0 %vm44_vm1, %v2017_v27  ;;  %1208 = vrot.lane.b32.xlu0 %v1109_v28, %s2497_s16 }
 0x87d   :  { %2389 = vmatprep.subr.mxu0 %v2495_v0  ;;  %2397 = vmatprep.mubr.msk.f32.mxu0 %vm2496_vm0, %v2495_v0 }
 0x87e   :  { %1224 = vrot.lane.b32.xlu1 %v1111_v26, %s2498_s19 }
 0x880   :  { %1220 = vrot.lane.b32.xlu0 %v1109_v28, %s2498_s19 }
 0x882   :  { %1222 = vrot.lane.b32.xlu1 %v1110_v16, %s2498_s19 }
 0x8e4   :  { %v1211_v29 = vpop.permute.xlu0 %1210 }
 0x8e5   :  { %v1217_v4 = vsel %vm2596_vm6, %v1110_v16, %v1211_v29 }
 0x8e6   :  { %v1233_v47 = vmax.f32 %v1217_v4, %v1110_v16 }
 0x8e8   :  { %v1215_v30 = vpop.permute.xlu1 %1214 }
 0x8e9   :  { %v1219_v31 = vsel %vm2596_vm6, %v1112_v23, %v1215_v30 }
 0x8ea   :  { %v1213_v32 = vpop.permute.xlu0 %1212  ;;  %v1235_v2 = vmax.f32 %v1219_v31, %v1112_v23 }
 0x8eb   :  { %v1218_v34 = vsel %vm2596_vm6, %v1111_v26, %v1213_v32 }
 0x8ec   :  { %v1227_v33 = vpop.permute.xlu1 %1226  ;;  %v1234_v37 = vmax.f32 %v1218_v34, %v1111_v26 }
 0x8ed   :  { %v1231_v35 = vsel %vm2600_vm7, %v1112_v23, %v1227_v33 }
 0x8ee   :  { %v1239_v3 = vmax.f32 %v1235_v2, %v1231_v35  ;;  %v1209_v36 = vpop.permute.xlu0 %1208 }
 0x8ef   :  { %v1216_v46 = vsel %vm2596_vm6, %v1109_v28, %v1209_v36 }
 0x8f0   :  { %2357 = vmatprep.subr.mxu1 %v1239_v3  ;;  %v1225_v42 = vpop.permute.xlu1 %1224  ;;  %v1232_v51 = vmax.f32 %v1216_v46, %v1109_v28 }
 0x8f1   :  { %v1230_v43 = vsel %vm2600_vm7, %v1111_v26, %v1225_v42  ;;  %2358 = vmatpush3.msra.mxu1 %v1239_v3  ;;  %v2043_v3 = vld [vmem:[%s3372_s1 + $0x350] sm:$0xff] }
 0x8f2   :  { %v1238_v44 = vmax.f32 %v1234_v37, %v1230_v43  ;;  %v1221_v45 = vpop.permute.xlu0 %1220 }
 0x8f3   :  { %v1228_v49 = vsel %vm2600_vm7, %v1109_v28, %v1221_v45 }
 0x8f4   :  { %2359 = vmatprep.subr.mxu1 %v1238_v44  ;;  %v1223_v48 = vpop.permute.xlu1 %1222  ;;  %v1236_v53 = vmax.f32 %v1232_v51, %v1228_v49 }
 0x8f5   :  { %v1229_v50 = vsel %vm2600_vm7, %v1110_v16, %v1223_v48  ;;  %2360 = vmatpush3.msra.mxu1 %v1238_v44  ;;  %v2016_v16 = vld [vmem:[%s3372_s1 + $0x270] sm:$0xff] }
 0x8f6   :  { %v1237_v52 = vmax.f32 %v1233_v47, %v1229_v50 }
 0x8f8   :  { %2361 = vmatprep.subr.mxu1 %v1237_v52 }
 0x8f9   :  { %2362 = vmatpush3.msra.mxu1 %v1237_v52 }
 0x8fa   :  { %2363 = vmatprep.subr.mxu1 %v1236_v53 }
 0x8fb   :  { %2364 = vmatpush3.msra.mxu1 %v1236_v53 }
 0x93c   :  { %v1188_v54 = vpop.f32.mrf.mxu0 }
 0x93d   :  { %1206 = vrot.lane.b32.xlu1 %v1188_v54, %s2500_s24  ;;  %1204 = vrot.lane.b32.xlu0 %v1188_v54, %s2499_s0 }
 0x93e   :  { %v2356_v55 = vpop.f32.mrf.mxu0 }
 0x941   :  { %1202 = vrot.lane.b32.xlu1 %v1188_v54, %s2501_s27  ;;  %1200 = vrot.lane.b32.xlu0 %v1188_v54, %s2498_s19 }
 0x945   :  { %1198 = vrot.lane.b32.xlu1 %v1188_v54, %s2497_s16  ;;  %1196 = vrot.lane.b32.xlu0 %v1188_v54, %s2502_s28 }
 0x949   :  { %1194 = vrot.lane.b32.xlu1 %v1188_v54, %s2505_s30  ;;  %1192 = vrot.lane.b32.xlu0 %v1188_v54, %s2504_s29 }
 0x94d   :  { %1253 = vperm.xlu1 %2480, %v3068_v39   ;;  %1249 = vperm.xlu0 %2481, %v3074_v40  }
 0x951   :  { %1245 = vperm.xlu1 %2480, %v3080_v41  }
 0x955   :  { %1241 = vperm.xlu1 %2480, %v3086_v57  }
 0x9af   :  { %v1205_v59 = vpop.permute.xlu0 %1204  ;;  %v1207_v60 = vpop.permute.xlu1 %1206 }
 0x9b0   :  { %2365 = vmatprep.subr.mxu1 %v1207_v60 }
 0x9b1   :  { %2366 = vmatpush3.msra.mxu1 %v1207_v60 }
 0x9b2   :  { %2367 = vmatprep.subr.mxu1 %v1205_v59 }
 0x9b3   :  { %v1201_v62 = vpop.permute.xlu0 %1200  ;;  %2368 = vmatpush3.msra.mxu1 %v1205_v59  ;;  %v1203_v63 = vpop.permute.xlu1 %1202 }
 0x9b4   :  { %2369 = vmatprep.subr.mxu1 %v1203_v63 }
 0x9b5   :  { %2370 = vmatpush3.msra.mxu1 %v1203_v63 }
 0x9b6   :  { %2371 = vmatprep.subr.mxu1 %v1201_v62 }
 0x9b7   :  { %2372 = vmatpush3.msra.mxu1 %v1201_v62  ;;  %v1199_v5 = vpop.permute.xlu1 %1198  ;;  %v1197_v10 = vpop.permute.xlu0 %1196 }
 0x9b8   :  { %2373 = vmatprep.subr.mxu1 %v1188_v54 }
 0x9b9   :  { %2374 = vmatpush3.msra.mxu1 %v1188_v54 }
 0x9ba   :  { %2375 = vmatprep.subr.mxu1 %v1199_v5 }
 0x9bb   :  { %2376 = vmatpush3.msra.mxu1 %v1199_v5  ;;  %v1195_v11 = vpop.permute.xlu1 %1194  ;;  %v1193_v12 = vpop.permute.xlu0 %1192  ;;  %v3185_v5 = vshrl.u32 %v14_v6, 7 }
 0x9bc   :  { %2377 = vmatprep.subr.mxu1 %v1197_v10 }
 0x9bd   :  { %2378 = vmatpush3.msra.mxu1 %v1197_v10  ;;  %v1702_v10 = vmul.u32 24, %v2590_v7  ;;  %v1699_v7 = vadd.s32 104, %v3185_v5 }
 0x9be   :  { %2379 = vmatprep.subr.mxu1 %v1195_v11 }
 0x9bf   :  { %2380 = vmatpush3.msra.mxu1 %v1195_v11  ;;  %v2511_v11 = vmov 5  }
 0x9c0   :  { %2381 = vmatprep.subr.mxu1 %v1193_v12  ;;  %2482 = vset.pattern.permute.xlu0 %v2511_v11 }
 0x9c1   :  { %2382 = vmatpush3.msra.mxu1 %v1193_v12  ;;  %2483 = vset.pattern.permute.xlu1 %v2511_v11  ;;  %v1701_v12 = vadd.s32 120, %v3185_v5 }
 0x9c2   :  { %2384 = vmatmul.mubr.msk.f32.vlgmr.msra.gmra.mxu1 %vm186_vm8, %v2014_v13  ;;  %v3191_v13 = vadd.s32 4, %v1702_v10 }
 0x9c3   :  { %2386 = vmatprep.mubr.msk.f32.mxu1 %vm186_vm8, %v2015_v15  ;;  %v1700_v15 = vadd.s32 112, %v3185_v5 }
 0x9c4   :  { %vm1719_vm3 = vcmp.ge.s32.totalorder %v1701_v12, %v3191_v13  ;;  %v3196_v6 = vadd.s32 16, %v3191_v13 }
 0x9c5   :  { %vm1718_vm5 = vcmp.ge.s32.totalorder %v1700_v15, %v3191_v13 }
 0x9c6   :  { %2387 = vmatmul.mubr.msk.f32.gmra.mxu1 %vm186_vm8, %v2016_v16  ;;  %vm1736_vm4 = vcmp.lt.s32.totalorder %v1701_v12, %v3196_v6  ;;  %v2512_v16 = vmov 0.0625   ;;  %vm1717_vm8 = vcmp.ge.s32.totalorder %v1699_v7, %v3191_v13  ;;  %vm1734_vm9 = vcmp.lt.s32.totalorder %v1699_v7, %v3196_v6 }
 0x9c7   :  { %vm1750_vm11 = vmand %vm1717_vm8, %vm1734_vm9 }
 0x9c8   :  { %v1254_v17 = vpop.permute.xlu1 %1253  ;;  %v1250_v25 = vpop.permute.xlu0 %1249 }
 0x9cc   :  { %v1246_v18 = vpop.permute.xlu1 %1245 }
 0x9d0   :  { %v1242_v28 = vpop.permute.xlu1 %1241 }
 0xa82   :  { %v2385_v20 = vpop.f32.mrf.mxu1 }
 0xa83   :  { %v1340_v21 = vadd.f32 %v2385_v20, %v1246_v18 }
 0xa84   :  { %v1334_v22 = vpop.f32.mrf.mxu1 }
 0xa85   :  { %v1354_v23 = vmax.f32 %v1340_v21, 0.0  ;;  %v1335_v32 = vadd.f32 %v1334_v22, %v1242_v28  ;;  %v2031_v28 = vld [vmem:[%s3372_s1 + $0x2f0] sm:$0xff] }
 0xa86   :  { %v2388_v24 = vpop.f32.mrf.mxu1 }
 0xa87   :  { %v3103_v26 = vsel %vm2687_vm15, %v1354_v23, 0.0  ;;  %v1350_v27 = vadd.f32 %v2388_v24, %v1254_v17  ;;  %v1353_v35 = vmax.f32 %v1335_v32, 0.0  ;;  %v2513_v17 = vmov 7   ;;  %v2027_v24 = vld [vmem:[%s3372_s1 + $0x2d0] sm:$0xff]  ;;  %v2038_v32 = vld [vmem:[%s3372_s1 + $0x328] sm:$0xff] }
 0xa88   :  { %v1344_v29 = vpop.f32.mrf.mxu1  ;;  %1470 = vrot.lane.b32.xlu1 %v3103_v26, %s2497_s16 }
 0xa89   :  { %v1356_v30 = vmax.f32 %v1350_v27, 0.0  ;;  %v1345_v31 = vadd.f32 %v1344_v29, %v1250_v25  ;;  %v1357_v36 = vsel %vm2687_vm15, %v1353_v35, 0.0  ;;  %v2030_v25 = vld [vmem:[%s3372_s1 + $0x2e8] sm:$0xff]  ;;  %v2032_v27 = vld [vmem:[%s3372_s1 + $0x2f8] sm:$0xff]  ;;  %v2033_v29 = vld [vmem:[%s3372_s1 + $0x300] sm:$0xff] }
 0xa8b   :  { %v1360_v2 = vsel %vm2687_vm15, %v1356_v30, 0.0  ;;  %v1355_v33 = vmax.f32 %v1345_v31, 0.0  ;;  %2390 = vmatpush3.msk.msra.mxu0 %vm2687_vm15, %v1356_v30  ;;  %v2036_v30 = vld [vmem:[%s3372_s1 + $0x318] sm:$0xff]  ;;  %v2035_v31 = vld [vmem:[%s3372_s1 + $0x310] sm:$0xff] }
 0xa8c   :  { %2391 = vmatprep.subr.mxu0 %v2495_v0  ;;  %1474 = vrot.lane.b32.xlu0 %v1360_v2, %s2497_s16 }
 0xa8d   :  { %v1359_v34 = vsel %vm2687_vm15, %v1355_v33, 0.0  ;;  %2392 = vmatpush3.msk.msra.mxu0 %vm2687_vm15, %v1355_v33  ;;  %v2040_v33 = vld [vmem:[%s3372_s1 + $0x338] sm:$0xff] }
 0xa8e   :  { %2393 = vmatprep.subr.mxu0 %v2495_v0  ;;  %1472 = vrot.lane.b32.xlu1 %v1359_v34, %s2497_s16 }
 0xa8f   :  { %2394 = vmatpush3.msk.msra.mxu0 %vm2687_vm15, %v1354_v23 }
 0xa90   :  { %1486 = vrot.lane.b32.xlu0 %v1360_v2, %s2498_s19  ;;  %2395 = vmatprep.subr.mxu0 %v2495_v0 }
 0xa91   :  { %2396 = vmatpush3.msk.msra.mxu0 %vm2687_vm15, %v1353_v35  ;;  %v2042_v35 = vld [vmem:[%s3372_s1 + $0x348] sm:$0xff] }
 0xa92   :  { %2398 = vmatmul.mubr.msk.f32.vlgmr.msra.gmra.mxu0 %vm44_vm1, %v2043_v3  ;;  %1524 = vmatprep.subr.mxu0 %v2495_v0  ;;  %v2041_v3 = vld [vmem:[%s3372_s1 + $0x340] sm:$0xff] }
 0xa93   :  { %1468 = vrot.lane.b32.xlu1 %v1357_v36, %s2497_s16  ;;  %2049 = vmatpush1.msk.msra.mxu0 %vm2687_vm15, %v2915_v14 }
 0xa94   :  { %1484 = vrot.lane.b32.xlu0 %v1359_v34, %s2498_s19  ;;  %1526 = vmatprep.subr.mxu0 %v2495_v0 }
 0xa95   :  { %2050 = vmatpush1.msk.msra.mxu0 %vm2687_vm15, %v2909_v61  ;;  %2053 = vmatprep.mubr.msk.f32.mxu0 %vm679_vm2, %v2028_v9 }
 0xa96   :  { %1528 = vmatprep.subr.mxu0 %v2495_v0 }
 0xa97   :  { %1480 = vrot.lane.b32.xlu1 %v1357_v36, %s2498_s19  ;;  %2051 = vmatpush1.msk.msra.mxu0 %vm2687_vm15, %v2920_v1 }
 0xa98   :  { %1482 = vrot.lane.b32.xlu0 %v3103_v26, %s2498_s19  ;;  %1530 = vmatprep.subr.mxu0 %v2495_v0 }
 0xafa   :  { %v1471_v14 = vpop.permute.xlu1 %1470 }
 0xafb   :  { %v1477_v49 = vsel %vm2596_vm6, %v3103_v26, %v1471_v14  ;;  %v1697_v14 = vadd.s32 88, %v3185_v5 }
 0xafc   :  { %v1493_v54 = vmax.f32 %v1477_v49, %v3103_v26  ;;  %v42_v49 = vld [vmem:[%s3372_s1 + $0x48] sm:$0xff] }
 0xafe   :  { %v1475_v37 = vpop.permute.xlu0 %1474 }
 0xaff   :  { %v1479_v42 = vsel %vm2596_vm6, %v1360_v2, %v1475_v37  ;;  %v1696_v37 = vadd.s32 80, %v3185_v5 }
 0xb00   :  { %v1473_v4 = vpop.permute.xlu1 %1472  ;;  %v1495_v61 = vmax.f32 %v1479_v42, %v1360_v2  ;;  %v1695_v42 = vadd.s32 72, %v3185_v5 }
 0xb01   :  { %v1478_v44 = vsel %vm2596_vm6, %v1359_v34, %v1473_v4  ;;  %v1694_v4 = vadd.s32 64, %v3185_v5 }
 0xb02   :  { %v1487_v43 = vpop.permute.xlu0 %1486  ;;  %v1494_v47 = vmax.f32 %v1478_v44, %v1359_v34  ;;  %vm1713_vm8 = vcmp.ge.s32.totalorder %v1695_v42, %v3191_v13  ;;  %vm1730_vm9 = vcmp.lt.s32.totalorder %v1695_v42, %v3196_v6  ;;  %v1691_v44 = vadd.s32 40, %v3185_v5 }
 0xb03   :  { %v1491_v45 = vsel %vm2600_vm7, %v1360_v2, %v1487_v43  ;;  %v2037_v2 = vld [vmem:[%s3372_s1 + $0x320] sm:$0xff]  ;;  %v1692_v43 = vadd.s32 48, %v3185_v5 }
 0xb04   :  { %v1499_v1 = vmax.f32 %v1495_v61, %v1491_v45  ;;  %v1693_v61 = vadd.s32 56, %v3185_v5  ;;  %v1690_v45 = vadd.s32 32, %v3185_v5 }
 0xb05   :  { %v1469_v46 = vpop.permute.xlu1 %1468 }
 0xb06   :  { %v1485_v48 = vpop.permute.xlu0 %1484  ;;  %1531 = vmatpush1.msra.mxu0 %v1499_v1  ;;  %v1476_v52 = vsel %vm2596_vm6, %v1357_v36, %v1469_v46  ;;  %vm1735_vm6 = vcmp.lt.s32.totalorder %v1700_v15, %v3196_v6  ;;  %v1689_v1 = vadd.s32 24, %v3185_v5  ;;  %v1688_v46 = vadd.s32 16, %v3185_v5 }
 0xb07   :  { %v1490_v50 = vsel %vm2600_vm7, %v1359_v34, %v1485_v48  ;;  %1532 = vmatprep.subr.mxu0 %v2495_v0  ;;  %v1492_v59 = vmax.f32 %v1476_v52, %v1357_v36  ;;  %vm1751_vm10 = vmand %vm1718_vm5, %vm1735_vm6  ;;  %v2039_v34 = vld [vmem:[%s3372_s1 + $0x330] sm:$0xff]  ;;  %vm1714_vm5 = vcmp.ge.s32.totalorder %v1696_v37, %v3191_v13  ;;  %vm1731_vm6 = vcmp.lt.s32.totalorder %v1696_v37, %v3196_v6  ;;  %v41_v48 = vld [vmem:[%s3372_s1 + $0x40] sm:$0xff] }
 0xb08   :  { %v1498_v51 = vmax.f32 %v1494_v47, %v1490_v50  ;;  %v1687_v47 = vadd.s32 8, %v3185_v5 }
 0xb09   :  { %v1481_v53 = vpop.permute.xlu1 %1480 }
 0xb0a   :  { %v1483_v55 = vpop.permute.xlu0 %1482  ;;  %1533 = vmatpush1.msra.mxu0 %v1498_v51  ;;  %v1488_v56 = vsel %vm2600_vm7, %v1357_v36, %v1481_v53  ;;  %v1698_v36 = vadd.s32 96, %v3185_v5 }
 0xb0b   :  { %v1489_v38 = vsel %vm2600_vm7, %v3103_v26, %v1483_v55  ;;  %1534 = vmatprep.subr.mxu0 %v2495_v0  ;;  %v1496_v62 = vmax.f32 %v1492_v59, %v1488_v56  ;;  %vm1752_vm7 = vmand %vm1719_vm3, %vm1736_vm4  ;;  %v2029_v26 = vld [vmem:[%s3372_s1 + $0x2e0] sm:$0xff]  ;;  %vm1715_vm3 = vcmp.ge.s32.totalorder %v1697_v14, %v3191_v13 }
 0xb0c   :  { %v1497_v60 = vmax.f32 %v1493_v54, %v1489_v38  ;;  %2400 = vmatprep.subr.msk.mxu1 %vm1752_vm7, %v2512_v16  ;;  %vm1716_vm12 = vcmp.ge.s32.totalorder %v1698_v36, %v3191_v13  ;;  %vm1733_vm13 = vcmp.lt.s32.totalorder %v1698_v36, %v3196_v6 }
 0xb0d   :  { %2401 = vmatpush3.msk.msra.mxu1 %vm1752_vm7, %v2512_v16  ;;  %vm1749_vm14 = vmand %vm1716_vm12, %vm1733_vm13  ;;  %vm1729_vm12 = vcmp.lt.s32.totalorder %v1694_v4, %v3196_v6 }
 0xb0e   :  { %1535 = vmatpush1.msra.mxu0 %v1497_v60  ;;  %2402 = vmatprep.subr.msk.mxu1 %vm1751_vm10, %v2512_v16  ;;  %vm1747_vm7 = vmand %vm1714_vm5, %vm1731_vm6  ;;  %vm1727_vm5 = vcmp.lt.s32.totalorder %v1692_v43, %v3196_v6 }
 0xb0f   :  { %1536 = vmatprep.subr.mxu0 %v2495_v0  ;;  %2403 = vmatpush3.msk.msra.mxu1 %vm1751_vm10, %v2512_v16  ;;  %vm1746_vm10 = vmand %vm1713_vm8, %vm1730_vm9  ;;  %vm1726_vm8 = vcmp.lt.s32.totalorder %v1691_v44, %v3196_v6 }
 0xb10   :  { %1537 = vmatpush1.msra.mxu0 %v1496_v62  ;;  %2404 = vmatprep.subr.msk.mxu1 %vm1750_vm11, %v2512_v16 }
 0xb11   :  { %1538 = vmatprep.subr.mxu0 %v2495_v0  ;;  %2405 = vmatpush3.msk.msra.mxu1 %vm1750_vm11, %v2512_v16  ;;  %vm1712_vm11 = vcmp.ge.s32.totalorder %v1694_v4, %v3191_v13 }
 0xb12   :  { %2406 = vmatprep.subr.msk.mxu1 %vm1749_vm14, %v2512_v16  ;;  %vm1745_vm13 = vmand %vm1712_vm11, %vm1729_vm12  ;;  %vm1725_vm11 = vcmp.lt.s32.totalorder %v1690_v45, %v3196_v6 }
 0xb13   :  { %2407 = vmatpush3.msk.msra.mxu1 %vm1749_vm14, %v2512_v16  ;;  %vm1711_vm14 = vcmp.ge.s32.totalorder %v1693_v61, %v3191_v13 }
 0xb52   :  { %v1448_v8 = vpop.f32.mrf.mxu0 }
 0xb53   :  { %1466 = vrot.lane.b32.xlu0 %v1448_v8, %s2500_s24  ;;  %1464 = vrot.lane.b32.xlu1 %v1448_v8, %s2499_s0 }
 0xb54   :  { %v2399_v63 = vpop.f32.mrf.mxu0 }
 0xb57   :  { %1462 = vrot.lane.b32.xlu0 %v1448_v8, %s2501_s27  ;;  %1460 = vrot.lane.b32.xlu1 %v1448_v8, %s2498_s19 }
 0xb5b   :  { %1458 = vrot.lane.b32.xlu0 %v1448_v8, %s2497_s16  ;;  %1456 = vrot.lane.b32.xlu1 %v1448_v8, %s2502_s28  ;;  %s2514_s28 = smov 24  }
 0xb5f   :  { %1454 = vrot.lane.b32.xlu0 %v1448_v8, %s2505_s30  ;;  %1452 = vrot.lane.b32.xlu1 %v1448_v8, %s2504_s29 }
 0xb63   :  { %1630 = vperm.xlu0 %2482, %v3086_v57   ;;  %1634 = vperm.xlu1 %2483, %v3080_v41  }
 0xb67   :  { %1638 = vperm.xlu1 %2483, %v3074_v40   ;;  %1642 = vperm.xlu0 %2482, %v3068_v39  }
 0xb6b   :  { %2484 = vset.pattern.permute.xlu1 %v2513_v17  ;;  %2485 = vset.pattern.permute.xlu0 %v2513_v17 }
 0xb6c   :  { %1658 = vperm.xlu1 %2484, %v3086_v57   ;;  %1662 = vperm.xlu0 %2485, %v3080_v41  }
 0xb70   :  { %1666 = vperm.xlu1 %2484, %v3074_v40   ;;  %1860 = vrot.lane.b32.xlu0 %v41_v48, %s2514_s28 }
 0xb74   :  { %1670 = vperm.xlu1 %2484, %v3068_v39  }
 0xb78   :  { %1862 = vrot.lane.b32.xlu1 %v42_v49, %s2514_s28 }
 0xbc5   :  { %v1467_v18 = vpop.permute.xlu0 %1466  ;;  %v1465_v20 = vpop.permute.xlu1 %1464 }
 0xbc6   :  { %1539 = vmatpush1.msra.mxu0 %v1467_v18 }
 0xbc7   :  { %1540 = vmatprep.subr.mxu0 %v2495_v0 }
 0xbc8   :  { %1541 = vmatpush1.msra.mxu0 %v1465_v20 }
 0xbc9   :  { %v1463_v41 = vpop.permute.xlu0 %1462  ;;  %1542 = vmatprep.subr.mxu0 %v2495_v0  ;;  %v1461_v21 = vpop.permute.xlu1 %1460 }
 0xbca   :  { %1543 = vmatpush1.msra.mxu0 %v1463_v41 }
 0xbcb   :  { %1544 = vmatprep.subr.mxu0 %v2495_v0 }
 0xbcc   :  { %1545 = vmatpush1.msra.mxu0 %v1461_v21 }
 0xbcd   :  { %v1459_v22 = vpop.permute.xlu0 %1458  ;;  %1546 = vmatprep.subr.mxu0 %v2495_v0  ;;  %v1457_v40 = vpop.permute.xlu1 %1456 }
 0xbce   :  { %1547 = vmatpush1.msra.mxu0 %v1448_v8 }
 0xbcf   :  { %1548 = vmatprep.subr.mxu0 %v2495_v0 }
 0xbd0   :  { %1549 = vmatpush1.msra.mxu0 %v1459_v22 }
 0xbd1   :  { %1550 = vmatprep.subr.mxu0 %v2495_v0  ;;  %v1455_v39 = vpop.permute.xlu0 %1454  ;;  %v1453_v23 = vpop.permute.xlu1 %1452 }
 0xbd2   :  { %1551 = vmatpush1.msra.mxu0 %v1457_v40 }
 0xbd3   :  { %1552 = vmatprep.subr.mxu0 %v2495_v0 }
 0xbd4   :  { %1553 = vmatpush1.msra.mxu0 %v1455_v39 }
 0xbd5   :  { %1554 = vmatprep.subr.mxu0 %v2495_v0 }
 0xbd6   :  { %1555 = vmatpush1.msra.mxu0 %v1453_v23 }
 0xbd7   :  { %1586 = vmatprep.subr.mxu0 %v2495_v0 }
 0xbd8   :  { %2052 = vmatpush2.msk.msra.mxu0 %vm2687_vm15, %v2924_v19  ;;  %v2034_v19 = vld [vmem:[%s3372_s1 + $0x308] sm:$0xff] }
 0xbd9   :  { %1589 = vmatmul.mubr.f32.vlgmr.msra.gmra.mxu0 %v2027_v24 }
 0xbda   :  { %2054 = vmatprep.mubr.msk.f32.mxu0 %vm679_vm2, %v2030_v25 }
 0xbdd   :  { %1594 = vmatmul.mubr.f32.gmra.mxu0 %v2029_v26 }
 0xbde   :  { %2055 = vmatprep.mubr.msk.f32.mxu0 %vm679_vm2, %v2032_v27  ;;  %v1631_v54 = vpop.permute.xlu0 %1630  ;;  %v1635_v56 = vpop.permute.xlu1 %1634 }
 0xbe1   :  { %1599 = vmatmul.mubr.f32.gmra.mxu0 %v2031_v28 }
 0xbe2   :  { %2056 = vmatprep.mubr.msk.f32.mxu0 %vm679_vm2, %v2034_v19  ;;  %v1639_v62 = vpop.permute.xlu1 %1638 }
 0xbe5   :  { %1604 = vmatmul.mubr.f32.gmra.mxu0 %v2033_v29 }
 0xbe6   :  { %2057 = vmatprep.mubr.msk.f32.mxu0 %vm679_vm2, %v2036_v30 }
 0xbe9   :  { %1609 = vmatmul.mubr.f32.gmra.mxu0 %v2035_v31 }
 0xbea   :  { %2058 = vmatprep.mubr.msk.f32.mxu0 %vm679_vm2, %v2038_v32 }
 0xbed   :  { %1614 = vmatmul.mubr.f32.gmra.mxu0 %v2037_v2 }
 0xbee   :  { %2059 = vmatprep.mubr.msk.f32.mxu0 %vm679_vm2, %v2040_v33 }
 0xbf1   :  { %1619 = vmatmul.mubr.f32.gmra.mxu0 %v2039_v34  ;;  %v2515_v34 = vmov 8  }
 0xbf2   :  { %2060 = vmatprep.mubr.msk.f32.mxu0 %vm679_vm2, %v2042_v35  ;;  %vm1732_vm2 = vcmp.lt.s32.totalorder %v1697_v14, %v3196_v6  ;;  %2486 = vset.pattern.permute.xlu0 %v2515_v34 }
 0xbf3   :  { %vm1748_vm4 = vmand %vm1715_vm3, %vm1732_vm2  ;;  %vm1728_vm3 = vcmp.lt.s32.totalorder %v1693_v61, %v3196_v6  ;;  %1855 = vperm.xlu0 %2486, %v3086_v57  }
 0xbf4   :  { %2408 = vmatprep.subr.msk.mxu1 %vm1748_vm4, %v2512_v16  ;;  %vm1744_vm2 = vmand %vm1711_vm14, %vm1728_vm3  ;;  %vm1724_vm14 = vcmp.lt.s32.totalorder %v1689_v1, %v3196_v6 }
 0xbf5   :  { %1624 = vmatmul.mubr.f32.gmra.mxu0 %v2041_v3  ;;  %2409 = vmatpush3.msk.msra.mxu1 %vm1748_vm4, %v2512_v16  ;;  %vm1710_vm4 = vcmp.ge.s32.totalorder %v1692_v43, %v3191_v13 }
 0xbf6   :  { %2410 = vmatprep.subr.msk.mxu1 %vm1747_vm7, %v2512_v16  ;;  %vm1743_vm6 = vmand %vm1710_vm4, %vm1727_vm5  ;;  %vm1723_vm4 = vcmp.lt.s32.totalorder %v1688_v46, %v3196_v6 }
 0xbf7   :  { %2411 = vmatpush3.msk.msra.mxu1 %vm1747_vm7, %v2512_v16  ;;  %vm1709_vm7 = vcmp.ge.s32.totalorder %v1691_v44, %v3191_v13 }
 0xbf8   :  { %2412 = vmatprep.subr.msk.mxu1 %vm1746_vm10, %v2512_v16  ;;  %vm1742_vm9 = vmand %vm1709_vm7, %vm1726_vm8  ;;  %vm1722_vm7 = vcmp.lt.s32.totalorder %v1687_v47, %v3196_v6 }
 0xbf9   :  { %2413 = vmatpush3.msk.msra.mxu1 %vm1746_vm10, %v2512_v16  ;;  %vm1708_vm10 = vcmp.ge.s32.totalorder %v1690_v45, %v3191_v13 }
 0xbfa   :  { %2414 = vmatprep.subr.msk.mxu1 %vm1745_vm13, %v2512_v16  ;;  %vm1741_vm12 = vmand %vm1708_vm10, %vm1725_vm11  ;;  %vm1721_vm10 = vcmp.lt.s32.totalorder %v3185_v5, %v3196_v6 }
 0xbfb   :  { %2415 = vmatpush3.msk.msra.mxu1 %vm1745_vm13, %v2512_v16  ;;  %vm1707_vm13 = vcmp.ge.s32.totalorder %v1689_v1, %v3191_v13 }
 0xbfc   :  { %2416 = vmatprep.subr.msk.mxu1 %vm1744_vm2, %v2512_v16  ;;  %vm1740_vm3 = vmand %vm1707_vm13, %vm1724_vm14 }
 0xbfd   :  { %2417 = vmatpush3.msk.msra.mxu1 %vm1744_vm2, %v2512_v16  ;;  %vm1706_vm2 = vcmp.ge.s32.totalorder %v1688_v46, %v3191_v13 }
 0xbfe   :  { %2418 = vmatprep.subr.msk.mxu1 %vm1743_vm6, %v2512_v16  ;;  %vm1739_vm5 = vmand %vm1706_vm2, %vm1723_vm4 }
 0xbff   :  { %2419 = vmatpush3.msk.msra.mxu1 %vm1743_vm6, %v2512_v16  ;;  %vm1705_vm6 = vcmp.ge.s32.totalorder %v1687_v47, %v3191_v13 }
 0xc00   :  { %2420 = vmatprep.subr.msk.mxu1 %vm1742_vm9, %v2512_v16  ;;  %vm1738_vm8 = vmand %vm1705_vm6, %vm1722_vm7 }
 0xc01   :  { %2421 = vmatpush3.msk.msra.mxu1 %vm1742_vm9, %v2512_v16  ;;  %vm1704_vm9 = vcmp.ge.s32.totalorder %v3185_v5, %v3191_v13  ;;  %v1643_v5 = vpop.permute.xlu0 %1642  ;;  %v1659_v13 = vpop.permute.xlu1 %1658 }
 0xc02   :  { %2422 = vmatprep.subr.msk.mxu1 %vm1741_vm12, %v2512_v16  ;;  %vm1737_vm11 = vmand %vm1704_vm9, %vm1721_vm10 }
 0xc03   :  { %2423 = vmatpush3.msk.msra.mxu1 %vm1741_vm12, %v2512_v16  ;;  %vm1864_vm12 = vcmask 195584  }
 0xc04   :  { %2424 = vmatprep.subr.msk.mxu1 %vm1740_vm3, %v2512_v16 }
 0xc05   :  { %2425 = vmatpush3.msk.msra.mxu1 %vm1740_vm3, %v2512_v16  ;;  %v1663_v17 = vpop.permute.xlu0 %1662  ;;  %v1667_v39 = vpop.permute.xlu1 %1666 }
 0xc06   :  { %2426 = vmatprep.subr.msk.mxu1 %vm1739_vm5, %v2512_v16 }
 0xc07   :  { %2427 = vmatpush3.msk.msra.mxu1 %vm1739_vm5, %v2512_v16 }
 0xc08   :  { %2428 = vmatprep.subr.msk.mxu1 %vm1738_vm8, %v2512_v16 }
 0xc09   :  { %2429 = vmatpush3.msk.msra.mxu1 %vm1738_vm8, %v2512_v16  ;;  %v1671_v31 = vpop.permute.xlu1 %1670  ;;  %v1861_v14 = vpop.permute.xlu0 %1860 }
 0xc0a   :  { %2430 = vmatprep.subr.msk.mxu1 %vm1737_vm11, %v2512_v16 }
 0xc0b   :  { %2431 = vmatpush3.msk.msra.mxu1 %vm1737_vm11, %v2512_v16 }
 0xc0c   :  { %2438 = vmatprep.subr.mxu1 %v2495_v0 }
 0xc0d   :  { %v1863_v42 = vpop.permute.xlu1 %1862 }
 0xc0e   :  { %v1865_v58 = vsel %vm1864_vm12, %v1861_v14, %v1863_v42 }
 0xc6e   :  { %v1856_v57 = vpop.permute.xlu0 %1855 }
 0xc99   :  { %v1590_v50 = vpop.f32.mrf.mxu0 }
 0xc9a   :  { %v1645_v59 = vadd.f32 %v1631_v54, %v1590_v50 }
 0xc9b   :  { %v1592_v51 = vpop.f32.mrf.mxu0 }
 0xc9c   :  { %v1649_v63 = vmax.f32 %v1645_v59, 0.0 }
 0xc9d   :  { %v1595_v52 = vpop.f32.mrf.mxu0 }
 0xc9e   :  { %v1646_v9 = vadd.f32 %v1635_v56, %v1595_v52 }
 0xc9f   :  { %v1597_v53 = vpop.f32.mrf.mxu0 }
 0xca0   :  { %v1650_v15 = vmax.f32 %v1646_v9, 0.0 }
 0xca1   :  { %v1600_v55 = vpop.f32.mrf.mxu0 }
 0xca2   :  { %v1647_v6 = vadd.f32 %v1639_v62, %v1600_v55 }
 0xca3   :  { %v1602_v38 = vpop.f32.mrf.mxu0 }
 0xca4   :  { %v1651_v21 = vmax.f32 %v1647_v6, 0.0 }
 0xca5   :  { %v1605_v60 = vpop.f32.mrf.mxu0 }
 0xca6   :  { %v1648_v22 = vadd.f32 %v1643_v5, %v1605_v60 }
 0xca7   :  { %v1607_v8 = vpop.f32.mrf.mxu0 }
 0xca8   :  { %v1652_v27 = vmax.f32 %v1648_v22, 0.0 }
 0xca9   :  { %v1610_v10 = vpop.f32.mrf.mxu0 }
 0xcaa   :  { %v1653_v11 = vadd.f32 %v1649_v63, %v1610_v10 }
 0xcab   :  { %v1612_v12 = vpop.f32.mrf.mxu0 }
 0xcac   :  { %v1673_v7 = vadd.f32 %v1659_v13, %v1653_v11 }
 0xcad   :  { %v1615_v16 = vpop.f32.mrf.mxu0 }
 0xcae   :  { %v1677_v18 = vmax.f32 %v1673_v7, 0.0  ;;  %v1654_v20 = vadd.f32 %v1650_v15, %v1615_v16 }
 0xcaf   :  { %v1617_v41 = vpop.f32.mrf.mxu0 }
 0xcb0   :  { %v1674_v40 = vadd.f32 %v1663_v17, %v1654_v20  ;;  %2432 = vmatprep.mubr.msk.f32.mxu1 %vm2687_vm15, %v1677_v18 }
 0xcb1   :  { %v1620_v23 = vpop.f32.mrf.mxu0 }
 0xcb2   :  { %v1678_v24 = vmax.f32 %v1674_v40, 0.0  ;;  %v1655_v25 = vadd.f32 %v1651_v21, %v1620_v23 }
 0xcb3   :  { %v1622_v26 = vpop.f32.mrf.mxu0 }
 0xcb4   :  { %v1675_v28 = vadd.f32 %v1667_v39, %v1655_v25  ;;  %2433 = vmatmul.mubr.msk.f32.vlgmr.msra.gmra.mxu1 %vm2687_vm15, %v1678_v24 }
 0xcb5   :  { %v1625_v19 = vpop.f32.mrf.mxu0 }
 0xcb6   :  { %v1679_v29 = vmax.f32 %v1675_v28, 0.0  ;;  %v1656_v30 = vadd.f32 %v1652_v27, %v1625_v19 }
 0xcb7   :  { %v1627_v32 = vpop.f32.mrf.mxu0 }
 0xcb8   :  { %v1676_v2 = vadd.f32 %v1671_v31, %v1656_v30  ;;  %2435 = vmatprep.mubr.msk.f32.mxu1 %vm2687_vm15, %v1679_v29 }
 0xcba   :  { %v1680_v33 = vmax.f32 %v1676_v2, 0.0 }
 0xcbc   :  { %2436 = vmatmul.mubr.msk.f32.gmra.mxu1 %vm2687_vm15, %v1680_v33 }
 0xcbd   :  { %2446 = vmatprep.mubr.msk.f32.mxu1 %vm2496_vm0, %v2495_v0  ;;  %vm1944_vm0 = vcmask 10240  }
 0xd74   :  { %v2434_v35 = vpop.f32.mrf.mxu1 }
 0xd76   :  { %v1835_v3 = vpop.f32.mrf.mxu1 }
 0xd7c   :  { %v2437_v36 = vpop.f32.mrf.mxu1 }
 0xd7d   :  { %2439 = vmatpush3.msra.mxu1 %v2437_v36 }
 0xd7e   :  { %v1845_v37 = vpop.f32.mrf.mxu1  ;;  %2440 = vmatprep.subr.mxu1 %v2495_v0 }
 0xd7f   :  { %2441 = vmatpush3.msra.mxu1 %v1845_v37 }
 0xd80   :  { %2442 = vmatprep.subr.mxu1 %v2495_v0 }
 0xd81   :  { %2443 = vmatpush3.msra.mxu1 %v2434_v35 }
 0xd82   :  { %2444 = vmatprep.subr.mxu1 %v2495_v0 }
 0xd83   :  { %2445 = vmatpush3.msra.mxu1 %v1835_v3 }
 0xd84   :  { %2447 = vmatmul.mubr.msk.f32.vlgmr.msra.gmra.mxu1 %vm44_vm1, %v1865_v58 }
 0xe44   :  { %v1934_v4 = vpop.f32.mrf.mxu1 }
 0xe45   :  { %v1935_v61 = vadd.f32 %v1934_v4, %v1856_v57 }
 0xe46   :  { %v2448_v43 = vpop.f32.mrf.mxu1 }
 0xe47   :  { %v2082_v44 = vmul.f32 -1.442695, %v1935_v61 }
 0xe49   :  { %2487 = vpow2.f32 %v2082_v44 }
 0xe56   :  { %v2488_v45 = vpop.eup %2487 }
 0xe57   :  { %v1941_v1 = vadd.f32 1.0, %v2488_v45 }
 0xe59   :  { %2489 = vrcp.f32 %v1941_v1 }
 0xe66   :  { %v2490_v46 = vpop.eup %2489 }
 0xe67   :  { %1945 = vst.msk [vmem:[%s3374_s3] sm:$0x7] %vm1944_vm0, %v2490_v46 }

</bundles_post_ra>
